<compile_context>
chip_gen: v5e
topology: v5e:2x2
jax: 0.10.0
libtpu: 0.0.40
codegen_flags: <defaults>
</compile_context>

<pallas_src>
import jax
import jax.numpy as jnp
from jax import lax
from jax.experimental import pallas as pl
from jax.experimental.pallas import tpu as pltpu

EPS = 1e-5  # nn.LayerNorm default


def _layernorm(x, gamma, beta):
    mean = jnp.mean(x, axis=-1, keepdims=True)
    var = jnp.mean((x - mean) ** 2, axis=-1, keepdims=True)
    return (x - mean) * lax.rsqrt(var + EPS) * gamma + beta


def _gelu(x):  # exact (erf) GELU, matching torch.nn.GELU default
    return 0.5 * x * (1.0 + lax.erf(x * 0.7071067811865476))


# --------------------------------------------------------------------------
# Fused kernel: one grid step per batch element; the whole depth loop runs
# inside the kernel with all weights resident in VMEM.
# --------------------------------------------------------------------------
def make_ceit_fused_call(B, N, C, H, HID, DEPTH):
    D = C // H

    def kernel(x_ref, pos_ref,
               n1g_ref, n1b_ref, wqkv_ref, wproj_ref, bproj_ref,
               n2g_ref, n2b_ref, w1_ref, b1_ref, w2_ref, b2_ref,
               nfg_ref, nfb_ref, o_ref):
        x = x_ref[...] + pos_ref[...]                       # (N, C); pos_drop = identity

        for i in range(DEPTH):                              # static unroll over blocks
            # ---------------- x = x + Attention(LayerNorm(x)) ----------------
            h = _layernorm(x, n1g_ref[i], n1b_ref[i])
            # Q columns of wqkv are pre-scaled by head_dim**-0.5 at prep time.
            qkv = jnp.dot(h, wqkv_ref[i],
                          preferred_element_type=jnp.float32)   # (N, 3C)
            wproj = wproj_ref[i]                                 # (C, C)

            attn_out = jnp.zeros((N, C), jnp.float32)
            for hh in range(H):                              # static unroll over heads
                q = qkv[:, hh * D:(hh + 1) * D]              # (N, D), already scaled
                k = qkv[:, C + hh * D:C + (hh + 1) * D]
                v = qkv[:, 2 * C + hh * D:2 * C + (hh + 1) * D]
                s = jnp.dot(q, k.T, preferred_element_type=jnp.float32)   # (N, N)
                s = s - jnp.max(s, axis=-1, keepdims=True)
                p = jnp.exp(s)
                p = p * pl.reciprocal(jnp.sum(p, axis=-1, keepdims=True),
                                      approx=True)
                oh = jnp.dot(p, v, preferred_element_type=jnp.float32)    # (N, D)
                # per-head projection slice (8-sublane aligned rows); summing the
                # per-head contributions == concat(heads) @ wproj, minus the concat.
                attn_out = attn_out + jnp.dot(
                    oh, wproj[hh * D:(hh + 1) * D, :],
                    preferred_element_type=jnp.float32)
            x = x + attn_out + bproj_ref[i]

            # ---------------- x = x + Mlp(LayerNorm(x)) ----------------
            h2 = _layernorm(x, n2g_ref[i], n2b_ref[i])
            a = jnp.dot(h2, w1_ref[i],
                        preferred_element_type=jnp.float32) + b1_ref[i]   # (N, HID)
            a = _gelu(a)
            x = x + jnp.dot(a, w2_ref[i],
                            preferred_element_type=jnp.float32) + b2_ref[i]

        # ---------------- final LayerNorm ----------------
        o_ref[...] = _layernorm(x, nfg_ref[...], nfb_ref[...])

    def run(x, pos, n1g, n1b, wqkv, wproj, bproj, n2g, n2b, w1, b1, w2, b2,
            nfg, nfb):
        full3 = lambda shape: pl.BlockSpec(shape, lambda b: (0, 0, 0))
        full2 = lambda shape: pl.BlockSpec(shape, lambda b: (0, 0))
        return pl.pallas_call(
            kernel,
            out_shape=jax.ShapeDtypeStruct((B, N, C), jnp.float32),
            grid=(B,),
            in_specs=[
                pl.BlockSpec((None, N, C), lambda b: (b, 0, 0)),   # x tokens
                full2((N, C)),                                     # pos_embed
                full3((DEPTH, 1, C)),                              # norm1 gamma
                full3((DEPTH, 1, C)),                              # norm1 beta
                full3((DEPTH, C, 3 * C)),                          # wqkv (Q pre-scaled)
                full3((DEPTH, C, C)),                              # wproj
                full3((DEPTH, 1, C)),                              # bproj
                full3((DEPTH, 1, C)),                              # norm2 gamma
                full3((DEPTH, 1, C)),                              # norm2 beta
                full3((DEPTH, C, HID)),                            # w1
                full3((DEPTH, 1, HID)),                            # b1
                full3((DEPTH, HID, C)),                            # w2
                full3((DEPTH, 1, C)),                              # b2
                full2((1, C)),                                     # final norm gamma
                full2((1, C)),                                     # final norm beta
            ],
            out_specs=pl.BlockSpec((None, N, C), lambda b: (b, 0, 0)),
            compiler_params=pltpu.CompilerParams(
                dimension_semantics=("parallel",)),                # v7x: 2 TCs
        )(x, pos, n1g, n1b, wqkv, wproj, bproj, n2g, n2b, w1, b1, w2, b2,
          nfg, nfb)

    return run


# --------------------------------------------------------------------------
# Parameter init (deterministic, mirrors CeIT._init_weights: trunc_normal
# std=0.02 for Linear weights / pos_embed, zeros for biases, LN = (1, 0)).
# Linear weights stored pre-transposed as [in, out] so kernels compute x@W+b.
# --------------------------------------------------------------------------
def init_ceit_params(key, depth, C, hidden, N):
    def tnorm(k, shape):
        return 0.02 * jax.random.truncated_normal(k, -2.0, 2.0, shape,
                                                  jnp.float32)

    k_pos, k_blocks = jax.random.split(key)
    params = {"pos_embed": tnorm(k_pos, (1, N, C))}
    blocks = []
    for i in range(depth):
        ks = jax.random.split(jax.random.fold_in(k_blocks, i), 4)
        blocks.append(dict(
            norm1_g=jnp.ones((1, C), jnp.float32),
            norm1_b=jnp.zeros((1, C), jnp.float32),
            wqkv=tnorm(ks[0], (C, 3 * C)),          # qkv_bias=False
            wproj=tnorm(ks[1], (C, C)),
            bproj=jnp.zeros((1, C), jnp.float32),
            norm2_g=jnp.ones((1, C), jnp.float32),
            norm2_b=jnp.zeros((1, C), jnp.float32),
            w1=tnorm(ks[2], (C, hidden)),
            b1=jnp.zeros((1, hidden), jnp.float32),
            w2=tnorm(ks[3], (hidden, C)),
            b2=jnp.zeros((1, C), jnp.float32),
        ))
    params["blocks"] = blocks
    params["norm_g"] = jnp.ones((1, C), jnp.float32)
    params["norm_b"] = jnp.zeros((1, C), jnp.float32)
    return params


# --------------------------------------------------------------------------
# Forward passes
# --------------------------------------------------------------------------
def ceit_forward_pallas(params, x, num_heads):
    B, N, C = x.shape
    blocks = params["blocks"]
    depth = len(blocks)
    hidden = blocks[0]["w1"].shape[1]
    scale = (C // num_heads) ** -0.5

    stack = lambda name: jnp.stack([blk[name] for blk in blocks])  # (depth, ...)
    wqkv = stack("wqkv")
    wqkv = wqkv.at[:, :, :C].multiply(scale)   # fold qk scale into the Q columns

    call = make_ceit_fused_call(B, N, C, num_heads, hidden, depth)
    return call(
        x, params["pos_embed"].reshape(N, C),
        stack("norm1_g"), stack("norm1_b"),
        wqkv, stack("wproj"), stack("bproj"),
        stack("norm2_g"), stack("norm2_b"),
        stack("w1"), stack("b1"), stack("w2"), stack("b2"),
        params["norm_g"], params["norm_b"])


def ceit_forward_ref(params, x, num_heads):
    """Pure-JAX reference mirroring the PyTorch forward (eval mode)."""
    B, N, C = x.shape
    D = C // num_heads
    scale = D ** -0.5
    x = x + params["pos_embed"]
    for blk in params["blocks"]:
        h = _layernorm(x, blk["norm1_g"], blk["norm1_b"])
        qkv = h @ blk["wqkv"]
        qkv = qkv.reshape(B, N, 3, num_heads, D).transpose(2, 0, 3, 1, 4)
        q, k, v = qkv[0], qkv[1], qkv[2]
        att = jnp.einsum("bhnd,bhmd->bhnm", q, k) * scale
        att = jax.nn.softmax(att, axis=-1)
        o = jnp.einsum("bhnm,bhmd->bhnd", att, v)
        o = o.transpose(0, 2, 1, 3).reshape(B, N, C)
        x = x + (o @ blk["wproj"] + blk["bproj"])
        h = _layernorm(x, blk["norm2_g"], blk["norm2_b"])
        a = _gelu(h @ blk["w1"] + blk["b1"])
        x = x + (a @ blk["w2"] + blk["b2"])
    return _layernorm(x, params["norm_g"], params["norm_b"])


# --------------------------------------------------------------------------
if __name__ == "__main__":
    # Small synthetic CeIT config (twoscaleIndex = -1 branch):
    #   img_size=128 -> num_patches = (128 // 32) ** 2 = 16
    #   embed_dim=32, depth=2, num_heads=4, mlp_ratio=4 -> hidden=128
    IMG_SIZE = 128
    EMBED_DIM = 32
    DEPTH = 2
    NUM_HEADS = 4
    MLP_RATIO = 4.0

    N = (IMG_SIZE // 32) ** 2
    HIDDEN = int(EMBED_DIM * MLP_RATIO)
    B = 2

    key = jax.random.PRNGKey(0)
    k_params, k_x = jax.random.split(key)
    params = init_ceit_params(k_params, DEPTH, EMBED_DIM, HIDDEN, N)

    # Patch tokens (output of the external to_patch_embedding), [B, N, C].
    x_tokens = jax.random.normal(k_x, (B, N, EMBED_DIM), jnp.float32)

    out = ceit_forward_pallas(params, x_tokens, NUM_HEADS)
    out = jax.block_until_ready(out)

    ref = ceit_forward_ref(params, x_tokens, NUM_HEADS)
    assert out.shape == (B, N, EMBED_DIM)
    # Tolerance loosened slightly vs. exact-f32 (2e-4) because the softmax
    # denominator uses the hardware approximate reciprocal (EUP vrcp).
    assert jnp.allclose(out, ref, rtol=2e-3, atol=2e-3)

    print("KERNEL_OK")
</pallas_src>

<mosaic_0001>
module attributes {stable_mosaic.version = 11 : i64} {
  func.func @kernel(%arg0: i32, %arg1: memref<1x16x32xf32, #tpu.memory_space<vmem>>, %arg2: memref<16x32xf32, #tpu.memory_space<vmem>>, %arg3: memref<2x1x32xf32, #tpu.memory_space<vmem>>, %arg4: memref<2x1x32xf32, #tpu.memory_space<vmem>>, %arg5: memref<2x32x96xf32, #tpu.memory_space<vmem>>, %arg6: memref<2x32x32xf32, #tpu.memory_space<vmem>>, %arg7: memref<2x1x32xf32, #tpu.memory_space<vmem>>, %arg8: memref<2x1x32xf32, #tpu.memory_space<vmem>>, %arg9: memref<2x1x32xf32, #tpu.memory_space<vmem>>, %arg10: memref<2x32x128xf32, #tpu.memory_space<vmem>>, %arg11: memref<2x1x128xf32, #tpu.memory_space<vmem>>, %arg12: memref<2x128x32xf32, #tpu.memory_space<vmem>>, %arg13: memref<2x1x32xf32, #tpu.memory_space<vmem>>, %arg14: memref<1x32xf32, #tpu.memory_space<vmem>>, %arg15: memref<1x32xf32, #tpu.memory_space<vmem>>, %arg16: memref<1x16x32xf32, #tpu.memory_space<vmem>>) attributes {dimension_semantics = [#tpu.dimension_semantics<parallel>], iteration_bounds = array<i64: 2>, scalar_prefetch = 0 : i64, scratch_operands = 0 : i64, tpu.core_type = #tpu.core_type<tc>, window_params = [{transform_indices = @transform_0, window_bounds = array<i64: 1, 16, 32>}, {pipeline_mode = #tpu.pipeline_mode<synchronous>, transform_indices = @transform_1, window_bounds = array<i64: 16, 32>}, {pipeline_mode = #tpu.pipeline_mode<synchronous>, transform_indices = @transform_2, window_bounds = array<i64: 2, 1, 32>}, {pipeline_mode = #tpu.pipeline_mode<synchronous>, transform_indices = @transform_3, window_bounds = array<i64: 2, 1, 32>}, {pipeline_mode = #tpu.pipeline_mode<synchronous>, transform_indices = @transform_4, window_bounds = array<i64: 2, 32, 96>}, {pipeline_mode = #tpu.pipeline_mode<synchronous>, transform_indices = @transform_5, window_bounds = array<i64: 2, 32, 32>}, {pipeline_mode = #tpu.pipeline_mode<synchronous>, transform_indices = @transform_6, window_bounds = array<i64: 2, 1, 32>}, {pipeline_mode = #tpu.pipeline_mode<synchronous>, transform_indices = @transform_7, window_bounds = array<i64: 2, 1, 32>}, {pipeline_mode = #tpu.pipeline_mode<synchronous>, transform_indices = @transform_8, window_bounds = array<i64: 2, 1, 32>}, {pipeline_mode = #tpu.pipeline_mode<synchronous>, transform_indices = @transform_9, window_bounds = array<i64: 2, 32, 128>}, {pipeline_mode = #tpu.pipeline_mode<synchronous>, transform_indices = @transform_10, window_bounds = array<i64: 2, 1, 128>}, {pipeline_mode = #tpu.pipeline_mode<synchronous>, transform_indices = @transform_11, window_bounds = array<i64: 2, 128, 32>}, {pipeline_mode = #tpu.pipeline_mode<synchronous>, transform_indices = @transform_12, window_bounds = array<i64: 2, 1, 32>}, {pipeline_mode = #tpu.pipeline_mode<synchronous>, transform_indices = @transform_13, window_bounds = array<i64: 1, 32>}, {pipeline_mode = #tpu.pipeline_mode<synchronous>, transform_indices = @transform_14, window_bounds = array<i64: 1, 32>}, {transform_indices = @transform_15, window_bounds = array<i64: 1, 16, 32>}]} {
    %c0 = arith.constant 0 : index
    %c0_0 = arith.constant 0 : index
    %c0_1 = arith.constant 0 : index
    %0 = vector.load %arg1[%c0, %c0_0, %c0_1] : memref<1x16x32xf32, #tpu.memory_space<vmem>>, vector<1x16x32xf32>
    %1 = vector.shape_cast %0 : vector<1x16x32xf32> to vector<16x32xf32>
    %c0_2 = arith.constant 0 : index
    %c0_3 = arith.constant 0 : index
    %2 = vector.load %arg2[%c0_2, %c0_3] : memref<16x32xf32, #tpu.memory_space<vmem>>, vector<16x32xf32>
    %3 = arith.addf %1, %2 : vector<16x32xf32>
    %c0_4 = arith.constant 0 : index
    %c0_5 = arith.constant 0 : index
    %c0_6 = arith.constant 0 : index
    %4 = vector.load %arg3[%c0_4, %c0_5, %c0_6] : memref<2x1x32xf32, #tpu.memory_space<vmem>>, vector<1x1x32xf32>
    %5 = vector.shape_cast %4 : vector<1x1x32xf32> to vector<1x32xf32>
    %c0_7 = arith.constant 0 : index
    %c0_8 = arith.constant 0 : index
    %c0_9 = arith.constant 0 : index
    %6 = vector.load %arg4[%c0_7, %c0_8, %c0_9] : memref<2x1x32xf32, #tpu.memory_space<vmem>>, vector<1x1x32xf32>
    %7 = vector.shape_cast %6 : vector<1x1x32xf32> to vector<1x32xf32>
    %cst = arith.constant dense<0.000000e+00> : vector<16xf32>
    %8 = vector.multi_reduction <add>, %3, %cst [1] : vector<16x32xf32> to vector<16xf32>
    %9 = vector.shape_cast %8 : vector<16xf32> to vector<16x1xf32>
    %cst_10 = arith.constant 3.200000e+01 : f32
    %10 = vector.broadcast %cst_10 : f32 to vector<16x1xf32>
    %11 = arith.divf %9, %10 : vector<16x1xf32>
    %12 = vector.broadcast %11 : vector<16x1xf32> to vector<16x32xf32>
    %13 = arith.subf %3, %12 : vector<16x32xf32>
    %14 = arith.mulf %13, %13 : vector<16x32xf32>
    %cst_11 = arith.constant dense<0.000000e+00> : vector<16xf32>
    %15 = vector.multi_reduction <add>, %14, %cst_11 [1] : vector<16x32xf32> to vector<16xf32>
    %16 = vector.shape_cast %15 : vector<16xf32> to vector<16x1xf32>
    %cst_12 = arith.constant 3.200000e+01 : f32
    %17 = vector.broadcast %cst_12 : f32 to vector<16x1xf32>
    %18 = arith.divf %16, %17 : vector<16x1xf32>
    %19 = vector.broadcast %11 : vector<16x1xf32> to vector<16x32xf32>
    %20 = arith.subf %3, %19 : vector<16x32xf32>
    %cst_13 = arith.constant 9.99999974E-6 : f32
    %21 = vector.broadcast %cst_13 : f32 to vector<16x1xf32>
    %22 = arith.addf %18, %21 : vector<16x1xf32>
    %23 = math.rsqrt %22 : vector<16x1xf32>
    %24 = vector.broadcast %23 : vector<16x1xf32> to vector<16x32xf32>
    %25 = arith.mulf %20, %24 : vector<16x32xf32>
    %26 = vector.broadcast %5 : vector<1x32xf32> to vector<16x32xf32>
    %27 = arith.mulf %25, %26 : vector<16x32xf32>
    %28 = vector.broadcast %7 : vector<1x32xf32> to vector<16x32xf32>
    %29 = arith.addf %27, %28 : vector<16x32xf32>
    %c0_14 = arith.constant 0 : index
    %c0_15 = arith.constant 0 : index
    %c0_16 = arith.constant 0 : index
    %30 = vector.load %arg5[%c0_14, %c0_15, %c0_16] : memref<2x32x96xf32, #tpu.memory_space<vmem>>, vector<1x32x96xf32>
    %31 = vector.shape_cast %30 : vector<1x32x96xf32> to vector<32x96xf32>
    %cst_17 = arith.constant dense<0.000000e+00> : vector<16x96xf32>
    %32 = tpu.matmul %29, %31, %cst_17 {dimension_numbers = #tpu.dot_dimension_numbers<[1], [0], [0], [1], [0, 0, 1, 1], [], []>} : vector<16x32xf32>, vector<32x96xf32>, vector<16x96xf32> -> vector<16x96xf32>
    %c0_18 = arith.constant 0 : index
    %c0_19 = arith.constant 0 : index
    %c0_20 = arith.constant 0 : index
    %33 = vector.load %arg6[%c0_18, %c0_19, %c0_20] : memref<2x32x32xf32, #tpu.memory_space<vmem>>, vector<1x32x32xf32>
    %34 = vector.shape_cast %33 : vector<1x32x32xf32> to vector<32x32xf32>
    %cst_21 = arith.constant 0.000000e+00 : f32
    %35 = vector.broadcast %cst_21 : f32 to vector<16x32xf32>
    %36 = vector.extract_strided_slice %32 {offsets = [0, 0], sizes = [16, 8], strides = [1, 1]} : vector<16x96xf32> to vector<16x8xf32>
    %37 = vector.extract_strided_slice %32 {offsets = [0, 32], sizes = [16, 8], strides = [1, 1]} : vector<16x96xf32> to vector<16x8xf32>
    %38 = vector.extract_strided_slice %32 {offsets = [0, 64], sizes = [16, 8], strides = [1, 1]} : vector<16x96xf32> to vector<16x8xf32>
    %39 = tpu.transpose %37, [1, 0] : vector<16x8xf32> -> vector<8x16xf32>
    %cst_22 = arith.constant dense<0.000000e+00> : vector<16x16xf32>
    %40 = tpu.matmul %36, %39, %cst_22 {dimension_numbers = #tpu.dot_dimension_numbers<[1], [0], [0], [1], [0, 0, 1, 1], [], []>} : vector<16x8xf32>, vector<8x16xf32>, vector<16x16xf32> -> vector<16x16xf32>
    %cst_23 = arith.constant dense<0xFF800000> : vector<16xf32>
    %41 = vector.multi_reduction <maximumf>, %40, %cst_23 [1] : vector<16x16xf32> to vector<16xf32>
    %42 = vector.shape_cast %41 : vector<16xf32> to vector<16x1xf32>
    %43 = vector.broadcast %42 : vector<16x1xf32> to vector<16x16xf32>
    %44 = arith.subf %40, %43 : vector<16x16xf32>
    %45 = math.exp %44 : vector<16x16xf32>
    %cst_24 = arith.constant dense<0.000000e+00> : vector<16xf32>
    %46 = vector.multi_reduction <add>, %45, %cst_24 [1] : vector<16x16xf32> to vector<16xf32>
    %47 = vector.shape_cast %46 : vector<16xf32> to vector<16x1xf32>
    %48 = tpu.reciprocal %47 {approx = true} : vector<16x1xf32> -> vector<16x1xf32>
    %49 = vector.broadcast %48 : vector<16x1xf32> to vector<16x16xf32>
    %50 = arith.mulf %45, %49 : vector<16x16xf32>
    %cst_25 = arith.constant dense<0.000000e+00> : vector<16x8xf32>
    %51 = tpu.matmul %50, %38, %cst_25 {dimension_numbers = #tpu.dot_dimension_numbers<[1], [0], [0], [1], [0, 0, 1, 1], [], []>} : vector<16x16xf32>, vector<16x8xf32>, vector<16x8xf32> -> vector<16x8xf32>
    %52 = vector.extract_strided_slice %34 {offsets = [0, 0], sizes = [8, 32], strides = [1, 1]} : vector<32x32xf32> to vector<8x32xf32>
    %cst_26 = arith.constant dense<0.000000e+00> : vector<16x32xf32>
    %53 = tpu.matmul %51, %52, %cst_26 {dimension_numbers = #tpu.dot_dimension_numbers<[1], [0], [0], [1], [0, 0, 1, 1], [], []>} : vector<16x8xf32>, vector<8x32xf32>, vector<16x32xf32> -> vector<16x32xf32>
    %54 = arith.addf %35, %53 : vector<16x32xf32>
    %55 = vector.extract_strided_slice %32 {offsets = [0, 8], sizes = [16, 8], strides = [1, 1]} : vector<16x96xf32> to vector<16x8xf32>
    %56 = vector.extract_strided_slice %32 {offsets = [0, 40], sizes = [16, 8], strides = [1, 1]} : vector<16x96xf32> to vector<16x8xf32>
    %57 = vector.extract_strided_slice %32 {offsets = [0, 72], sizes = [16, 8], strides = [1, 1]} : vector<16x96xf32> to vector<16x8xf32>
    %58 = tpu.transpose %56, [1, 0] : vector<16x8xf32> -> vector<8x16xf32>
    %cst_27 = arith.constant dense<0.000000e+00> : vector<16x16xf32>
    %59 = tpu.matmul %55, %58, %cst_27 {dimension_numbers = #tpu.dot_dimension_numbers<[1], [0], [0], [1], [0, 0, 1, 1], [], []>} : vector<16x8xf32>, vector<8x16xf32>, vector<16x16xf32> -> vector<16x16xf32>
    %cst_28 = arith.constant dense<0xFF800000> : vector<16xf32>
    %60 = vector.multi_reduction <maximumf>, %59, %cst_28 [1] : vector<16x16xf32> to vector<16xf32>
    %61 = vector.shape_cast %60 : vector<16xf32> to vector<16x1xf32>
    %62 = vector.broadcast %61 : vector<16x1xf32> to vector<16x16xf32>
    %63 = arith.subf %59, %62 : vector<16x16xf32>
    %64 = math.exp %63 : vector<16x16xf32>
    %cst_29 = arith.constant dense<0.000000e+00> : vector<16xf32>
    %65 = vector.multi_reduction <add>, %64, %cst_29 [1] : vector<16x16xf32> to vector<16xf32>
    %66 = vector.shape_cast %65 : vector<16xf32> to vector<16x1xf32>
    %67 = tpu.reciprocal %66 {approx = true} : vector<16x1xf32> -> vector<16x1xf32>
    %68 = vector.broadcast %67 : vector<16x1xf32> to vector<16x16xf32>
    %69 = arith.mulf %64, %68 : vector<16x16xf32>
    %cst_30 = arith.constant dense<0.000000e+00> : vector<16x8xf32>
    %70 = tpu.matmul %69, %57, %cst_30 {dimension_numbers = #tpu.dot_dimension_numbers<[1], [0], [0], [1], [0, 0, 1, 1], [], []>} : vector<16x16xf32>, vector<16x8xf32>, vector<16x8xf32> -> vector<16x8xf32>
    %71 = vector.extract_strided_slice %34 {offsets = [8, 0], sizes = [8, 32], strides = [1, 1]} : vector<32x32xf32> to vector<8x32xf32>
    %cst_31 = arith.constant dense<0.000000e+00> : vector<16x32xf32>
    %72 = tpu.matmul %70, %71, %cst_31 {dimension_numbers = #tpu.dot_dimension_numbers<[1], [0], [0], [1], [0, 0, 1, 1], [], []>} : vector<16x8xf32>, vector<8x32xf32>, vector<16x32xf32> -> vector<16x32xf32>
    %73 = arith.addf %54, %72 : vector<16x32xf32>
    %74 = vector.extract_strided_slice %32 {offsets = [0, 16], sizes = [16, 8], strides = [1, 1]} : vector<16x96xf32> to vector<16x8xf32>
    %75 = vector.extract_strided_slice %32 {offsets = [0, 48], sizes = [16, 8], strides = [1, 1]} : vector<16x96xf32> to vector<16x8xf32>
    %76 = vector.extract_strided_slice %32 {offsets = [0, 80], sizes = [16, 8], strides = [1, 1]} : vector<16x96xf32> to vector<16x8xf32>
    %77 = tpu.transpose %75, [1, 0] : vector<16x8xf32> -> vector<8x16xf32>
    %cst_32 = arith.constant dense<0.000000e+00> : vector<16x16xf32>
    %78 = tpu.matmul %74, %77, %cst_32 {dimension_numbers = #tpu.dot_dimension_numbers<[1], [0], [0], [1], [0, 0, 1, 1], [], []>} : vector<16x8xf32>, vector<8x16xf32>, vector<16x16xf32> -> vector<16x16xf32>
    %cst_33 = arith.constant dense<0xFF800000> : vector<16xf32>
    %79 = vector.multi_reduction <maximumf>, %78, %cst_33 [1] : vector<16x16xf32> to vector<16xf32>
    %80 = vector.shape_cast %79 : vector<16xf32> to vector<16x1xf32>
    %81 = vector.broadcast %80 : vector<16x1xf32> to vector<16x16xf32>
    %82 = arith.subf %78, %81 : vector<16x16xf32>
    %83 = math.exp %82 : vector<16x16xf32>
    %cst_34 = arith.constant dense<0.000000e+00> : vector<16xf32>
    %84 = vector.multi_reduction <add>, %83, %cst_34 [1] : vector<16x16xf32> to vector<16xf32>
    %85 = vector.shape_cast %84 : vector<16xf32> to vector<16x1xf32>
    %86 = tpu.reciprocal %85 {approx = true} : vector<16x1xf32> -> vector<16x1xf32>
    %87 = vector.broadcast %86 : vector<16x1xf32> to vector<16x16xf32>
    %88 = arith.mulf %83, %87 : vector<16x16xf32>
    %cst_35 = arith.constant dense<0.000000e+00> : vector<16x8xf32>
    %89 = tpu.matmul %88, %76, %cst_35 {dimension_numbers = #tpu.dot_dimension_numbers<[1], [0], [0], [1], [0, 0, 1, 1], [], []>} : vector<16x16xf32>, vector<16x8xf32>, vector<16x8xf32> -> vector<16x8xf32>
    %90 = vector.extract_strided_slice %34 {offsets = [16, 0], sizes = [8, 32], strides = [1, 1]} : vector<32x32xf32> to vector<8x32xf32>
    %cst_36 = arith.constant dense<0.000000e+00> : vector<16x32xf32>
    %91 = tpu.matmul %89, %90, %cst_36 {dimension_numbers = #tpu.dot_dimension_numbers<[1], [0], [0], [1], [0, 0, 1, 1], [], []>} : vector<16x8xf32>, vector<8x32xf32>, vector<16x32xf32> -> vector<16x32xf32>
    %92 = arith.addf %73, %91 : vector<16x32xf32>
    %93 = vector.extract_strided_slice %32 {offsets = [0, 24], sizes = [16, 8], strides = [1, 1]} : vector<16x96xf32> to vector<16x8xf32>
    %94 = vector.extract_strided_slice %32 {offsets = [0, 56], sizes = [16, 8], strides = [1, 1]} : vector<16x96xf32> to vector<16x8xf32>
    %95 = vector.extract_strided_slice %32 {offsets = [0, 88], sizes = [16, 8], strides = [1, 1]} : vector<16x96xf32> to vector<16x8xf32>
    %96 = tpu.transpose %94, [1, 0] : vector<16x8xf32> -> vector<8x16xf32>
    %cst_37 = arith.constant dense<0.000000e+00> : vector<16x16xf32>
    %97 = tpu.matmul %93, %96, %cst_37 {dimension_numbers = #tpu.dot_dimension_numbers<[1], [0], [0], [1], [0, 0, 1, 1], [], []>} : vector<16x8xf32>, vector<8x16xf32>, vector<16x16xf32> -> vector<16x16xf32>
    %cst_38 = arith.constant dense<0xFF800000> : vector<16xf32>
    %98 = vector.multi_reduction <maximumf>, %97, %cst_38 [1] : vector<16x16xf32> to vector<16xf32>
    %99 = vector.shape_cast %98 : vector<16xf32> to vector<16x1xf32>
    %100 = vector.broadcast %99 : vector<16x1xf32> to vector<16x16xf32>
    %101 = arith.subf %97, %100 : vector<16x16xf32>
    %102 = math.exp %101 : vector<16x16xf32>
    %cst_39 = arith.constant dense<0.000000e+00> : vector<16xf32>
    %103 = vector.multi_reduction <add>, %102, %cst_39 [1] : vector<16x16xf32> to vector<16xf32>
    %104 = vector.shape_cast %103 : vector<16xf32> to vector<16x1xf32>
    %105 = tpu.reciprocal %104 {approx = true} : vector<16x1xf32> -> vector<16x1xf32>
    %106 = vector.broadcast %105 : vector<16x1xf32> to vector<16x16xf32>
    %107 = arith.mulf %102, %106 : vector<16x16xf32>
    %cst_40 = arith.constant dense<0.000000e+00> : vector<16x8xf32>
    %108 = tpu.matmul %107, %95, %cst_40 {dimension_numbers = #tpu.dot_dimension_numbers<[1], [0], [0], [1], [0, 0, 1, 1], [], []>} : vector<16x16xf32>, vector<16x8xf32>, vector<16x8xf32> -> vector<16x8xf32>
    %109 = vector.extract_strided_slice %34 {offsets = [24, 0], sizes = [8, 32], strides = [1, 1]} : vector<32x32xf32> to vector<8x32xf32>
    %cst_41 = arith.constant dense<0.000000e+00> : vector<16x32xf32>
    %110 = tpu.matmul %108, %109, %cst_41 {dimension_numbers = #tpu.dot_dimension_numbers<[1], [0], [0], [1], [0, 0, 1, 1], [], []>} : vector<16x8xf32>, vector<8x32xf32>, vector<16x32xf32> -> vector<16x32xf32>
    %111 = arith.addf %92, %110 : vector<16x32xf32>
    %112 = arith.addf %3, %111 : vector<16x32xf32>
    %c0_42 = arith.constant 0 : index
    %c0_43 = arith.constant 0 : index
    %c0_44 = arith.constant 0 : index
    %113 = vector.load %arg7[%c0_42, %c0_43, %c0_44] : memref<2x1x32xf32, #tpu.memory_space<vmem>>, vector<1x1x32xf32>
    %114 = vector.shape_cast %113 : vector<1x1x32xf32> to vector<1x32xf32>
    %115 = vector.broadcast %114 : vector<1x32xf32> to vector<16x32xf32>
    %116 = arith.addf %112, %115 : vector<16x32xf32>
    %c0_45 = arith.constant 0 : index
    %c0_46 = arith.constant 0 : index
    %c0_47 = arith.constant 0 : index
    %117 = vector.load %arg8[%c0_45, %c0_46, %c0_47] : memref<2x1x32xf32, #tpu.memory_space<vmem>>, vector<1x1x32xf32>
    %118 = vector.shape_cast %117 : vector<1x1x32xf32> to vector<1x32xf32>
    %c0_48 = arith.constant 0 : index
    %c0_49 = arith.constant 0 : index
    %c0_50 = arith.constant 0 : index
    %119 = vector.load %arg9[%c0_48, %c0_49, %c0_50] : memref<2x1x32xf32, #tpu.memory_space<vmem>>, vector<1x1x32xf32>
    %120 = vector.shape_cast %119 : vector<1x1x32xf32> to vector<1x32xf32>
    %cst_51 = arith.constant dense<0.000000e+00> : vector<16xf32>
    %121 = vector.multi_reduction <add>, %116, %cst_51 [1] : vector<16x32xf32> to vector<16xf32>
    %122 = vector.shape_cast %121 : vector<16xf32> to vector<16x1xf32>
    %cst_52 = arith.constant 3.200000e+01 : f32
    %123 = vector.broadcast %cst_52 : f32 to vector<16x1xf32>
    %124 = arith.divf %122, %123 : vector<16x1xf32>
    %125 = vector.broadcast %124 : vector<16x1xf32> to vector<16x32xf32>
    %126 = arith.subf %116, %125 : vector<16x32xf32>
    %127 = arith.mulf %126, %126 : vector<16x32xf32>
    %cst_53 = arith.constant dense<0.000000e+00> : vector<16xf32>
    %128 = vector.multi_reduction <add>, %127, %cst_53 [1] : vector<16x32xf32> to vector<16xf32>
    %129 = vector.shape_cast %128 : vector<16xf32> to vector<16x1xf32>
    %cst_54 = arith.constant 3.200000e+01 : f32
    %130 = vector.broadcast %cst_54 : f32 to vector<16x1xf32>
    %131 = arith.divf %129, %130 : vector<16x1xf32>
    %132 = vector.broadcast %124 : vector<16x1xf32> to vector<16x32xf32>
    %133 = arith.subf %116, %132 : vector<16x32xf32>
    %cst_55 = arith.constant 9.99999974E-6 : f32
    %134 = vector.broadcast %cst_55 : f32 to vector<16x1xf32>
    %135 = arith.addf %131, %134 : vector<16x1xf32>
    %136 = math.rsqrt %135 : vector<16x1xf32>
    %137 = vector.broadcast %136 : vector<16x1xf32> to vector<16x32xf32>
    %138 = arith.mulf %133, %137 : vector<16x32xf32>
    %139 = vector.broadcast %118 : vector<1x32xf32> to vector<16x32xf32>
    %140 = arith.mulf %138, %139 : vector<16x32xf32>
    %141 = vector.broadcast %120 : vector<1x32xf32> to vector<16x32xf32>
    %142 = arith.addf %140, %141 : vector<16x32xf32>
    %c0_56 = arith.constant 0 : index
    %c0_57 = arith.constant 0 : index
    %c0_58 = arith.constant 0 : index
    %143 = vector.load %arg10[%c0_56, %c0_57, %c0_58] : memref<2x32x128xf32, #tpu.memory_space<vmem>>, vector<1x32x128xf32>
    %144 = vector.shape_cast %143 : vector<1x32x128xf32> to vector<32x128xf32>
    %cst_59 = arith.constant dense<0.000000e+00> : vector<16x128xf32>
    %145 = tpu.matmul %142, %144, %cst_59 {dimension_numbers = #tpu.dot_dimension_numbers<[1], [0], [0], [1], [0, 0, 1, 1], [], []>} : vector<16x32xf32>, vector<32x128xf32>, vector<16x128xf32> -> vector<16x128xf32>
    %c0_60 = arith.constant 0 : index
    %c0_61 = arith.constant 0 : index
    %c0_62 = arith.constant 0 : index
    %146 = vector.load %arg11[%c0_60, %c0_61, %c0_62] : memref<2x1x128xf32, #tpu.memory_space<vmem>>, vector<1x1x128xf32>
    %147 = vector.shape_cast %146 : vector<1x1x128xf32> to vector<1x128xf32>
    %148 = vector.broadcast %147 : vector<1x128xf32> to vector<16x128xf32>
    %149 = arith.addf %145, %148 : vector<16x128xf32>
    %cst_63 = arith.constant 5.000000e-01 : f32
    %150 = vector.broadcast %cst_63 : f32 to vector<16x128xf32>
    %151 = arith.mulf %150, %149 : vector<16x128xf32>
    %cst_64 = arith.constant 0.707106769 : f32
    %152 = vector.broadcast %cst_64 : f32 to vector<16x128xf32>
    %153 = arith.mulf %149, %152 : vector<16x128xf32>
    %154 = math.erf %153 : vector<16x128xf32>
    %cst_65 = arith.constant 1.000000e+00 : f32
    %155 = vector.broadcast %cst_65 : f32 to vector<16x128xf32>
    %156 = arith.addf %155, %154 : vector<16x128xf32>
    %157 = arith.mulf %151, %156 : vector<16x128xf32>
    %c0_66 = arith.constant 0 : index
    %c0_67 = arith.constant 0 : index
    %c0_68 = arith.constant 0 : index
    %158 = vector.load %arg12[%c0_66, %c0_67, %c0_68] : memref<2x128x32xf32, #tpu.memory_space<vmem>>, vector<1x128x32xf32>
    %159 = vector.shape_cast %158 : vector<1x128x32xf32> to vector<128x32xf32>
    %cst_69 = arith.constant dense<0.000000e+00> : vector<16x32xf32>
    %160 = tpu.matmul %157, %159, %cst_69 {dimension_numbers = #tpu.dot_dimension_numbers<[1], [0], [0], [1], [0, 0, 1, 1], [], []>} : vector<16x128xf32>, vector<128x32xf32>, vector<16x32xf32> -> vector<16x32xf32>
    %161 = arith.addf %116, %160 : vector<16x32xf32>
    %c0_70 = arith.constant 0 : index
    %c0_71 = arith.constant 0 : index
    %c0_72 = arith.constant 0 : index
    %162 = vector.load %arg13[%c0_70, %c0_71, %c0_72] : memref<2x1x32xf32, #tpu.memory_space<vmem>>, vector<1x1x32xf32>
    %163 = vector.shape_cast %162 : vector<1x1x32xf32> to vector<1x32xf32>
    %164 = vector.broadcast %163 : vector<1x32xf32> to vector<16x32xf32>
    %165 = arith.addf %161, %164 : vector<16x32xf32>
    %c1 = arith.constant 1 : index
    %c0_73 = arith.constant 0 : index
    %c0_74 = arith.constant 0 : index
    %166 = vector.load %arg3[%c1, %c0_73, %c0_74] : memref<2x1x32xf32, #tpu.memory_space<vmem>>, vector<1x1x32xf32>
    %167 = vector.shape_cast %166 : vector<1x1x32xf32> to vector<1x32xf32>
    %c1_75 = arith.constant 1 : index
    %c0_76 = arith.constant 0 : index
    %c0_77 = arith.constant 0 : index
    %168 = vector.load %arg4[%c1_75, %c0_76, %c0_77] : memref<2x1x32xf32, #tpu.memory_space<vmem>>, vector<1x1x32xf32>
    %169 = vector.shape_cast %168 : vector<1x1x32xf32> to vector<1x32xf32>
    %cst_78 = arith.constant dense<0.000000e+00> : vector<16xf32>
    %170 = vector.multi_reduction <add>, %165, %cst_78 [1] : vector<16x32xf32> to vector<16xf32>
    %171 = vector.shape_cast %170 : vector<16xf32> to vector<16x1xf32>
    %cst_79 = arith.constant 3.200000e+01 : f32
    %172 = vector.broadcast %cst_79 : f32 to vector<16x1xf32>
    %173 = arith.divf %171, %172 : vector<16x1xf32>
    %174 = vector.broadcast %173 : vector<16x1xf32> to vector<16x32xf32>
    %175 = arith.subf %165, %174 : vector<16x32xf32>
    %176 = arith.mulf %175, %175 : vector<16x32xf32>
    %cst_80 = arith.constant dense<0.000000e+00> : vector<16xf32>
    %177 = vector.multi_reduction <add>, %176, %cst_80 [1] : vector<16x32xf32> to vector<16xf32>
    %178 = vector.shape_cast %177 : vector<16xf32> to vector<16x1xf32>
    %cst_81 = arith.constant 3.200000e+01 : f32
    %179 = vector.broadcast %cst_81 : f32 to vector<16x1xf32>
    %180 = arith.divf %178, %179 : vector<16x1xf32>
    %181 = vector.broadcast %173 : vector<16x1xf32> to vector<16x32xf32>
    %182 = arith.subf %165, %181 : vector<16x32xf32>
    %cst_82 = arith.constant 9.99999974E-6 : f32
    %183 = vector.broadcast %cst_82 : f32 to vector<16x1xf32>
    %184 = arith.addf %180, %183 : vector<16x1xf32>
    %185 = math.rsqrt %184 : vector<16x1xf32>
    %186 = vector.broadcast %185 : vector<16x1xf32> to vector<16x32xf32>
    %187 = arith.mulf %182, %186 : vector<16x32xf32>
    %188 = vector.broadcast %167 : vector<1x32xf32> to vector<16x32xf32>
    %189 = arith.mulf %187, %188 : vector<16x32xf32>
    %190 = vector.broadcast %169 : vector<1x32xf32> to vector<16x32xf32>
    %191 = arith.addf %189, %190 : vector<16x32xf32>
    %c1_83 = arith.constant 1 : index
    %c0_84 = arith.constant 0 : index
    %c0_85 = arith.constant 0 : index
    %192 = vector.load %arg5[%c1_83, %c0_84, %c0_85] : memref<2x32x96xf32, #tpu.memory_space<vmem>>, vector<1x32x96xf32>
    %193 = vector.shape_cast %192 : vector<1x32x96xf32> to vector<32x96xf32>
    %cst_86 = arith.constant dense<0.000000e+00> : vector<16x96xf32>
    %194 = tpu.matmul %191, %193, %cst_86 {dimension_numbers = #tpu.dot_dimension_numbers<[1], [0], [0], [1], [0, 0, 1, 1], [], []>} : vector<16x32xf32>, vector<32x96xf32>, vector<16x96xf32> -> vector<16x96xf32>
    %c1_87 = arith.constant 1 : index
    %c0_88 = arith.constant 0 : index
    %c0_89 = arith.constant 0 : index
    %195 = vector.load %arg6[%c1_87, %c0_88, %c0_89] : memref<2x32x32xf32, #tpu.memory_space<vmem>>, vector<1x32x32xf32>
    %196 = vector.shape_cast %195 : vector<1x32x32xf32> to vector<32x32xf32>
    %cst_90 = arith.constant 0.000000e+00 : f32
    %197 = vector.broadcast %cst_90 : f32 to vector<16x32xf32>
    %198 = vector.extract_strided_slice %194 {offsets = [0, 0], sizes = [16, 8], strides = [1, 1]} : vector<16x96xf32> to vector<16x8xf32>
    %199 = vector.extract_strided_slice %194 {offsets = [0, 32], sizes = [16, 8], strides = [1, 1]} : vector<16x96xf32> to vector<16x8xf32>
    %200 = vector.extract_strided_slice %194 {offsets = [0, 64], sizes = [16, 8], strides = [1, 1]} : vector<16x96xf32> to vector<16x8xf32>
    %201 = tpu.transpose %199, [1, 0] : vector<16x8xf32> -> vector<8x16xf32>
    %cst_91 = arith.constant dense<0.000000e+00> : vector<16x16xf32>
    %202 = tpu.matmul %198, %201, %cst_91 {dimension_numbers = #tpu.dot_dimension_numbers<[1], [0], [0], [1], [0, 0, 1, 1], [], []>} : vector<16x8xf32>, vector<8x16xf32>, vector<16x16xf32> -> vector<16x16xf32>
    %cst_92 = arith.constant dense<0xFF800000> : vector<16xf32>
    %203 = vector.multi_reduction <maximumf>, %202, %cst_92 [1] : vector<16x16xf32> to vector<16xf32>
    %204 = vector.shape_cast %203 : vector<16xf32> to vector<16x1xf32>
    %205 = vector.broadcast %204 : vector<16x1xf32> to vector<16x16xf32>
    %206 = arith.subf %202, %205 : vector<16x16xf32>
    %207 = math.exp %206 : vector<16x16xf32>
    %cst_93 = arith.constant dense<0.000000e+00> : vector<16xf32>
    %208 = vector.multi_reduction <add>, %207, %cst_93 [1] : vector<16x16xf32> to vector<16xf32>
    %209 = vector.shape_cast %208 : vector<16xf32> to vector<16x1xf32>
    %210 = tpu.reciprocal %209 {approx = true} : vector<16x1xf32> -> vector<16x1xf32>
    %211 = vector.broadcast %210 : vector<16x1xf32> to vector<16x16xf32>
    %212 = arith.mulf %207, %211 : vector<16x16xf32>
    %cst_94 = arith.constant dense<0.000000e+00> : vector<16x8xf32>
    %213 = tpu.matmul %212, %200, %cst_94 {dimension_numbers = #tpu.dot_dimension_numbers<[1], [0], [0], [1], [0, 0, 1, 1], [], []>} : vector<16x16xf32>, vector<16x8xf32>, vector<16x8xf32> -> vector<16x8xf32>
    %214 = vector.extract_strided_slice %196 {offsets = [0, 0], sizes = [8, 32], strides = [1, 1]} : vector<32x32xf32> to vector<8x32xf32>
    %cst_95 = arith.constant dense<0.000000e+00> : vector<16x32xf32>
    %215 = tpu.matmul %213, %214, %cst_95 {dimension_numbers = #tpu.dot_dimension_numbers<[1], [0], [0], [1], [0, 0, 1, 1], [], []>} : vector<16x8xf32>, vector<8x32xf32>, vector<16x32xf32> -> vector<16x32xf32>
    %216 = arith.addf %197, %215 : vector<16x32xf32>
    %217 = vector.extract_strided_slice %194 {offsets = [0, 8], sizes = [16, 8], strides = [1, 1]} : vector<16x96xf32> to vector<16x8xf32>
    %218 = vector.extract_strided_slice %194 {offsets = [0, 40], sizes = [16, 8], strides = [1, 1]} : vector<16x96xf32> to vector<16x8xf32>
    %219 = vector.extract_strided_slice %194 {offsets = [0, 72], sizes = [16, 8], strides = [1, 1]} : vector<16x96xf32> to vector<16x8xf32>
    %220 = tpu.transpose %218, [1, 0] : vector<16x8xf32> -> vector<8x16xf32>
    %cst_96 = arith.constant dense<0.000000e+00> : vector<16x16xf32>
    %221 = tpu.matmul %217, %220, %cst_96 {dimension_numbers = #tpu.dot_dimension_numbers<[1], [0], [0], [1], [0, 0, 1, 1], [], []>} : vector<16x8xf32>, vector<8x16xf32>, vector<16x16xf32> -> vector<16x16xf32>
    %cst_97 = arith.constant dense<0xFF800000> : vector<16xf32>
    %222 = vector.multi_reduction <maximumf>, %221, %cst_97 [1] : vector<16x16xf32> to vector<16xf32>
    %223 = vector.shape_cast %222 : vector<16xf32> to vector<16x1xf32>
    %224 = vector.broadcast %223 : vector<16x1xf32> to vector<16x16xf32>
    %225 = arith.subf %221, %224 : vector<16x16xf32>
    %226 = math.exp %225 : vector<16x16xf32>
    %cst_98 = arith.constant dense<0.000000e+00> : vector<16xf32>
    %227 = vector.multi_reduction <add>, %226, %cst_98 [1] : vector<16x16xf32> to vector<16xf32>
    %228 = vector.shape_cast %227 : vector<16xf32> to vector<16x1xf32>
    %229 = tpu.reciprocal %228 {approx = true} : vector<16x1xf32> -> vector<16x1xf32>
    %230 = vector.broadcast %229 : vector<16x1xf32> to vector<16x16xf32>
    %231 = arith.mulf %226, %230 : vector<16x16xf32>
    %cst_99 = arith.constant dense<0.000000e+00> : vector<16x8xf32>
    %232 = tpu.matmul %231, %219, %cst_99 {dimension_numbers = #tpu.dot_dimension_numbers<[1], [0], [0], [1], [0, 0, 1, 1], [], []>} : vector<16x16xf32>, vector<16x8xf32>, vector<16x8xf32> -> vector<16x8xf32>
    %233 = vector.extract_strided_slice %196 {offsets = [8, 0], sizes = [8, 32], strides = [1, 1]} : vector<32x32xf32> to vector<8x32xf32>
    %cst_100 = arith.constant dense<0.000000e+00> : vector<16x32xf32>
    %234 = tpu.matmul %232, %233, %cst_100 {dimension_numbers = #tpu.dot_dimension_numbers<[1], [0], [0], [1], [0, 0, 1, 1], [], []>} : vector<16x8xf32>, vector<8x32xf32>, vector<16x32xf32> -> vector<16x32xf32>
    %235 = arith.addf %216, %234 : vector<16x32xf32>
    %236 = vector.extract_strided_slice %194 {offsets = [0, 16], sizes = [16, 8], strides = [1, 1]} : vector<16x96xf32> to vector<16x8xf32>
    %237 = vector.extract_strided_slice %194 {offsets = [0, 48], sizes = [16, 8], strides = [1, 1]} : vector<16x96xf32> to vector<16x8xf32>
    %238 = vector.extract_strided_slice %194 {offsets = [0, 80], sizes = [16, 8], strides = [1, 1]} : vector<16x96xf32> to vector<16x8xf32>
    %239 = tpu.transpose %237, [1, 0] : vector<16x8xf32> -> vector<8x16xf32>
    %cst_101 = arith.constant dense<0.000000e+00> : vector<16x16xf32>
    %240 = tpu.matmul %236, %239, %cst_101 {dimension_numbers = #tpu.dot_dimension_numbers<[1], [0], [0], [1], [0, 0, 1, 1], [], []>} : vector<16x8xf32>, vector<8x16xf32>, vector<16x16xf32> -> vector<16x16xf32>
    %cst_102 = arith.constant dense<0xFF800000> : vector<16xf32>
    %241 = vector.multi_reduction <maximumf>, %240, %cst_102 [1] : vector<16x16xf32> to vector<16xf32>
    %242 = vector.shape_cast %241 : vector<16xf32> to vector<16x1xf32>
    %243 = vector.broadcast %242 : vector<16x1xf32> to vector<16x16xf32>
    %244 = arith.subf %240, %243 : vector<16x16xf32>
    %245 = math.exp %244 : vector<16x16xf32>
    %cst_103 = arith.constant dense<0.000000e+00> : vector<16xf32>
    %246 = vector.multi_reduction <add>, %245, %cst_103 [1] : vector<16x16xf32> to vector<16xf32>
    %247 = vector.shape_cast %246 : vector<16xf32> to vector<16x1xf32>
    %248 = tpu.reciprocal %247 {approx = true} : vector<16x1xf32> -> vector<16x1xf32>
    %249 = vector.broadcast %248 : vector<16x1xf32> to vector<16x16xf32>
    %250 = arith.mulf %245, %249 : vector<16x16xf32>
    %cst_104 = arith.constant dense<0.000000e+00> : vector<16x8xf32>
    %251 = tpu.matmul %250, %238, %cst_104 {dimension_numbers = #tpu.dot_dimension_numbers<[1], [0], [0], [1], [0, 0, 1, 1], [], []>} : vector<16x16xf32>, vector<16x8xf32>, vector<16x8xf32> -> vector<16x8xf32>
    %252 = vector.extract_strided_slice %196 {offsets = [16, 0], sizes = [8, 32], strides = [1, 1]} : vector<32x32xf32> to vector<8x32xf32>
    %cst_105 = arith.constant dense<0.000000e+00> : vector<16x32xf32>
    %253 = tpu.matmul %251, %252, %cst_105 {dimension_numbers = #tpu.dot_dimension_numbers<[1], [0], [0], [1], [0, 0, 1, 1], [], []>} : vector<16x8xf32>, vector<8x32xf32>, vector<16x32xf32> -> vector<16x32xf32>
    %254 = arith.addf %235, %253 : vector<16x32xf32>
    %255 = vector.extract_strided_slice %194 {offsets = [0, 24], sizes = [16, 8], strides = [1, 1]} : vector<16x96xf32> to vector<16x8xf32>
    %256 = vector.extract_strided_slice %194 {offsets = [0, 56], sizes = [16, 8], strides = [1, 1]} : vector<16x96xf32> to vector<16x8xf32>
    %257 = vector.extract_strided_slice %194 {offsets = [0, 88], sizes = [16, 8], strides = [1, 1]} : vector<16x96xf32> to vector<16x8xf32>
    %258 = tpu.transpose %256, [1, 0] : vector<16x8xf32> -> vector<8x16xf32>
    %cst_106 = arith.constant dense<0.000000e+00> : vector<16x16xf32>
    %259 = tpu.matmul %255, %258, %cst_106 {dimension_numbers = #tpu.dot_dimension_numbers<[1], [0], [0], [1], [0, 0, 1, 1], [], []>} : vector<16x8xf32>, vector<8x16xf32>, vector<16x16xf32> -> vector<16x16xf32>
    %cst_107 = arith.constant dense<0xFF800000> : vector<16xf32>
    %260 = vector.multi_reduction <maximumf>, %259, %cst_107 [1] : vector<16x16xf32> to vector<16xf32>
    %261 = vector.shape_cast %260 : vector<16xf32> to vector<16x1xf32>
    %262 = vector.broadcast %261 : vector<16x1xf32> to vector<16x16xf32>
    %263 = arith.subf %259, %262 : vector<16x16xf32>
    %264 = math.exp %263 : vector<16x16xf32>
    %cst_108 = arith.constant dense<0.000000e+00> : vector<16xf32>
    %265 = vector.multi_reduction <add>, %264, %cst_108 [1] : vector<16x16xf32> to vector<16xf32>
    %266 = vector.shape_cast %265 : vector<16xf32> to vector<16x1xf32>
    %267 = tpu.reciprocal %266 {approx = true} : vector<16x1xf32> -> vector<16x1xf32>
    %268 = vector.broadcast %267 : vector<16x1xf32> to vector<16x16xf32>
    %269 = arith.mulf %264, %268 : vector<16x16xf32>
    %cst_109 = arith.constant dense<0.000000e+00> : vector<16x8xf32>
    %270 = tpu.matmul %269, %257, %cst_109 {dimension_numbers = #tpu.dot_dimension_numbers<[1], [0], [0], [1], [0, 0, 1, 1], [], []>} : vector<16x16xf32>, vector<16x8xf32>, vector<16x8xf32> -> vector<16x8xf32>
    %271 = vector.extract_strided_slice %196 {offsets = [24, 0], sizes = [8, 32], strides = [1, 1]} : vector<32x32xf32> to vector<8x32xf32>
    %cst_110 = arith.constant dense<0.000000e+00> : vector<16x32xf32>
    %272 = tpu.matmul %270, %271, %cst_110 {dimension_numbers = #tpu.dot_dimension_numbers<[1], [0], [0], [1], [0, 0, 1, 1], [], []>} : vector<16x8xf32>, vector<8x32xf32>, vector<16x32xf32> -> vector<16x32xf32>
    %273 = arith.addf %254, %272 : vector<16x32xf32>
    %274 = arith.addf %165, %273 : vector<16x32xf32>
    %c1_111 = arith.constant 1 : index
    %c0_112 = arith.constant 0 : index
    %c0_113 = arith.constant 0 : index
    %275 = vector.load %arg7[%c1_111, %c0_112, %c0_113] : memref<2x1x32xf32, #tpu.memory_space<vmem>>, vector<1x1x32xf32>
    %276 = vector.shape_cast %275 : vector<1x1x32xf32> to vector<1x32xf32>
    %277 = vector.broadcast %276 : vector<1x32xf32> to vector<16x32xf32>
    %278 = arith.addf %274, %277 : vector<16x32xf32>
    %c1_114 = arith.constant 1 : index
    %c0_115 = arith.constant 0 : index
    %c0_116 = arith.constant 0 : index
    %279 = vector.load %arg8[%c1_114, %c0_115, %c0_116] : memref<2x1x32xf32, #tpu.memory_space<vmem>>, vector<1x1x32xf32>
    %280 = vector.shape_cast %279 : vector<1x1x32xf32> to vector<1x32xf32>
    %c1_117 = arith.constant 1 : index
    %c0_118 = arith.constant 0 : index
    %c0_119 = arith.constant 0 : index
    %281 = vector.load %arg9[%c1_117, %c0_118, %c0_119] : memref<2x1x32xf32, #tpu.memory_space<vmem>>, vector<1x1x32xf32>
    %282 = vector.shape_cast %281 : vector<1x1x32xf32> to vector<1x32xf32>
    %cst_120 = arith.constant dense<0.000000e+00> : vector<16xf32>
    %283 = vector.multi_reduction <add>, %278, %cst_120 [1] : vector<16x32xf32> to vector<16xf32>
    %284 = vector.shape_cast %283 : vector<16xf32> to vector<16x1xf32>
    %cst_121 = arith.constant 3.200000e+01 : f32
    %285 = vector.broadcast %cst_121 : f32 to vector<16x1xf32>
    %286 = arith.divf %284, %285 : vector<16x1xf32>
    %287 = vector.broadcast %286 : vector<16x1xf32> to vector<16x32xf32>
    %288 = arith.subf %278, %287 : vector<16x32xf32>
    %289 = arith.mulf %288, %288 : vector<16x32xf32>
    %cst_122 = arith.constant dense<0.000000e+00> : vector<16xf32>
    %290 = vector.multi_reduction <add>, %289, %cst_122 [1] : vector<16x32xf32> to vector<16xf32>
    %291 = vector.shape_cast %290 : vector<16xf32> to vector<16x1xf32>
    %cst_123 = arith.constant 3.200000e+01 : f32
    %292 = vector.broadcast %cst_123 : f32 to vector<16x1xf32>
    %293 = arith.divf %291, %292 : vector<16x1xf32>
    %294 = vector.broadcast %286 : vector<16x1xf32> to vector<16x32xf32>
    %295 = arith.subf %278, %294 : vector<16x32xf32>
    %cst_124 = arith.constant 9.99999974E-6 : f32
    %296 = vector.broadcast %cst_124 : f32 to vector<16x1xf32>
    %297 = arith.addf %293, %296 : vector<16x1xf32>
    %298 = math.rsqrt %297 : vector<16x1xf32>
    %299 = vector.broadcast %298 : vector<16x1xf32> to vector<16x32xf32>
    %300 = arith.mulf %295, %299 : vector<16x32xf32>
    %301 = vector.broadcast %280 : vector<1x32xf32> to vector<16x32xf32>
    %302 = arith.mulf %300, %301 : vector<16x32xf32>
    %303 = vector.broadcast %282 : vector<1x32xf32> to vector<16x32xf32>
    %304 = arith.addf %302, %303 : vector<16x32xf32>
    %c1_125 = arith.constant 1 : index
    %c0_126 = arith.constant 0 : index
    %c0_127 = arith.constant 0 : index
    %305 = vector.load %arg10[%c1_125, %c0_126, %c0_127] : memref<2x32x128xf32, #tpu.memory_space<vmem>>, vector<1x32x128xf32>
    %306 = vector.shape_cast %305 : vector<1x32x128xf32> to vector<32x128xf32>
    %cst_128 = arith.constant dense<0.000000e+00> : vector<16x128xf32>
    %307 = tpu.matmul %304, %306, %cst_128 {dimension_numbers = #tpu.dot_dimension_numbers<[1], [0], [0], [1], [0, 0, 1, 1], [], []>} : vector<16x32xf32>, vector<32x128xf32>, vector<16x128xf32> -> vector<16x128xf32>
    %c1_129 = arith.constant 1 : index
    %c0_130 = arith.constant 0 : index
    %c0_131 = arith.constant 0 : index
    %308 = vector.load %arg11[%c1_129, %c0_130, %c0_131] : memref<2x1x128xf32, #tpu.memory_space<vmem>>, vector<1x1x128xf32>
    %309 = vector.shape_cast %308 : vector<1x1x128xf32> to vector<1x128xf32>
    %310 = vector.broadcast %309 : vector<1x128xf32> to vector<16x128xf32>
    %311 = arith.addf %307, %310 : vector<16x128xf32>
    %cst_132 = arith.constant 5.000000e-01 : f32
    %312 = vector.broadcast %cst_132 : f32 to vector<16x128xf32>
    %313 = arith.mulf %312, %311 : vector<16x128xf32>
    %cst_133 = arith.constant 0.707106769 : f32
    %314 = vector.broadcast %cst_133 : f32 to vector<16x128xf32>
    %315 = arith.mulf %311, %314 : vector<16x128xf32>
    %316 = math.erf %315 : vector<16x128xf32>
    %cst_134 = arith.constant 1.000000e+00 : f32
    %317 = vector.broadcast %cst_134 : f32 to vector<16x128xf32>
    %318 = arith.addf %317, %316 : vector<16x128xf32>
    %319 = arith.mulf %313, %318 : vector<16x128xf32>
    %c1_135 = arith.constant 1 : index
    %c0_136 = arith.constant 0 : index
    %c0_137 = arith.constant 0 : index
    %320 = vector.load %arg12[%c1_135, %c0_136, %c0_137] : memref<2x128x32xf32, #tpu.memory_space<vmem>>, vector<1x128x32xf32>
    %321 = vector.shape_cast %320 : vector<1x128x32xf32> to vector<128x32xf32>
    %cst_138 = arith.constant dense<0.000000e+00> : vector<16x32xf32>
    %322 = tpu.matmul %319, %321, %cst_138 {dimension_numbers = #tpu.dot_dimension_numbers<[1], [0], [0], [1], [0, 0, 1, 1], [], []>} : vector<16x128xf32>, vector<128x32xf32>, vector<16x32xf32> -> vector<16x32xf32>
    %323 = arith.addf %278, %322 : vector<16x32xf32>
    %c1_139 = arith.constant 1 : index
    %c0_140 = arith.constant 0 : index
    %c0_141 = arith.constant 0 : index
    %324 = vector.load %arg13[%c1_139, %c0_140, %c0_141] : memref<2x1x32xf32, #tpu.memory_space<vmem>>, vector<1x1x32xf32>
    %325 = vector.shape_cast %324 : vector<1x1x32xf32> to vector<1x32xf32>
    %326 = vector.broadcast %325 : vector<1x32xf32> to vector<16x32xf32>
    %327 = arith.addf %323, %326 : vector<16x32xf32>
    %c0_142 = arith.constant 0 : index
    %c0_143 = arith.constant 0 : index
    %328 = vector.load %arg14[%c0_142, %c0_143] : memref<1x32xf32, #tpu.memory_space<vmem>>, vector<1x32xf32>
    %c0_144 = arith.constant 0 : index
    %c0_145 = arith.constant 0 : index
    %329 = vector.load %arg15[%c0_144, %c0_145] : memref<1x32xf32, #tpu.memory_space<vmem>>, vector<1x32xf32>
    %cst_146 = arith.constant dense<0.000000e+00> : vector<16xf32>
    %330 = vector.multi_reduction <add>, %327, %cst_146 [1] : vector<16x32xf32> to vector<16xf32>
    %331 = vector.shape_cast %330 : vector<16xf32> to vector<16x1xf32>
    %cst_147 = arith.constant 3.200000e+01 : f32
    %332 = vector.broadcast %cst_147 : f32 to vector<16x1xf32>
    %333 = arith.divf %331, %332 : vector<16x1xf32>
    %334 = vector.broadcast %333 : vector<16x1xf32> to vector<16x32xf32>
    %335 = arith.subf %327, %334 : vector<16x32xf32>
    %336 = arith.mulf %335, %335 : vector<16x32xf32>
    %cst_148 = arith.constant dense<0.000000e+00> : vector<16xf32>
    %337 = vector.multi_reduction <add>, %336, %cst_148 [1] : vector<16x32xf32> to vector<16xf32>
    %338 = vector.shape_cast %337 : vector<16xf32> to vector<16x1xf32>
    %cst_149 = arith.constant 3.200000e+01 : f32
    %339 = vector.broadcast %cst_149 : f32 to vector<16x1xf32>
    %340 = arith.divf %338, %339 : vector<16x1xf32>
    %341 = vector.broadcast %333 : vector<16x1xf32> to vector<16x32xf32>
    %342 = arith.subf %327, %341 : vector<16x32xf32>
    %cst_150 = arith.constant 9.99999974E-6 : f32
    %343 = vector.broadcast %cst_150 : f32 to vector<16x1xf32>
    %344 = arith.addf %340, %343 : vector<16x1xf32>
    %345 = math.rsqrt %344 : vector<16x1xf32>
    %346 = vector.broadcast %345 : vector<16x1xf32> to vector<16x32xf32>
    %347 = arith.mulf %342, %346 : vector<16x32xf32>
    %348 = vector.broadcast %328 : vector<1x32xf32> to vector<16x32xf32>
    %349 = arith.mulf %347, %348 : vector<16x32xf32>
    %350 = vector.broadcast %329 : vector<1x32xf32> to vector<16x32xf32>
    %351 = arith.addf %349, %350 : vector<16x32xf32>
    %c0_151 = arith.constant 0 : index
    %c0_152 = arith.constant 0 : index
    %c0_153 = arith.constant 0 : index
    %352 = vector.load %arg16[%c0_151, %c0_152, %c0_153] : memref<1x16x32xf32, #tpu.memory_space<vmem>>, vector<1x16x32xf32>
    %353 = vector.shape_cast %352 : vector<1x16x32xf32> to vector<16x32xf32>
    %354 = vector.shape_cast %351 : vector<16x32xf32> to vector<1x16x32xf32>
    tpu.vector_store %arg16[%c0_151, %c0_152, %c0_153], %354 {strides = array<i32>} : memref<1x16x32xf32, #tpu.memory_space<vmem>>, vector<1x16x32xf32>,
    return
  }
  func.func @transform_0(%arg0: i32) -> (i32, i32, i32) {
    %c0_i32 = arith.constant 0 : i32
    %c0_i32_0 = arith.constant 0 : i32
    %c0_i32_1 = arith.constant 0 : i32
    return %arg0, %c0_i32, %c0_i32_0 : i32, i32, i32
  }
  func.func @transform_1(%arg0: i32) -> (i32, i32) {
    %c0_i32 = arith.constant 0 : i32
    %c0_i32_0 = arith.constant 0 : i32
    %c0_i32_1 = arith.constant 0 : i32
    return %c0_i32, %c0_i32_0 : i32, i32
  }
  func.func @transform_2(%arg0: i32) -> (i32, i32, i32) {
    %c0_i32 = arith.constant 0 : i32
    %c0_i32_0 = arith.constant 0 : i32
    %c0_i32_1 = arith.constant 0 : i32
    %c0_i32_2 = arith.constant 0 : i32
    return %c0_i32, %c0_i32_0, %c0_i32_1 : i32, i32, i32
  }
  func.func @transform_3(%arg0: i32) -> (i32, i32, i32) {
    %c0_i32 = arith.constant 0 : i32
    %c0_i32_0 = arith.constant 0 : i32
    %c0_i32_1 = arith.constant 0 : i32
    %c0_i32_2 = arith.constant 0 : i32
    return %c0_i32, %c0_i32_0, %c0_i32_1 : i32, i32, i32
  }
  func.func @transform_4(%arg0: i32) -> (i32, i32, i32) {
    %c0_i32 = arith.constant 0 : i32
    %c0_i32_0 = arith.constant 0 : i32
    %c0_i32_1 = arith.constant 0 : i32
    %c0_i32_2 = arith.constant 0 : i32
    return %c0_i32, %c0_i32_0, %c0_i32_1 : i32, i32, i32
  }
  func.func @transform_5(%arg0: i32) -> (i32, i32, i32) {
    %c0_i32 = arith.constant 0 : i32
    %c0_i32_0 = arith.constant 0 : i32
    %c0_i32_1 = arith.constant 0 : i32
    %c0_i32_2 = arith.constant 0 : i32
    return %c0_i32, %c0_i32_0, %c0_i32_1 : i32, i32, i32
  }
  func.func @transform_6(%arg0: i32) -> (i32, i32, i32) {
    %c0_i32 = arith.constant 0 : i32
    %c0_i32_0 = arith.constant 0 : i32
    %c0_i32_1 = arith.constant 0 : i32
    %c0_i32_2 = arith.constant 0 : i32
    return %c0_i32, %c0_i32_0, %c0_i32_1 : i32, i32, i32
  }
  func.func @transform_7(%arg0: i32) -> (i32, i32, i32) {
    %c0_i32 = arith.constant 0 : i32
    %c0_i32_0 = arith.constant 0 : i32
    %c0_i32_1 = arith.constant 0 : i32
    %c0_i32_2 = arith.constant 0 : i32
    return %c0_i32, %c0_i32_0, %c0_i32_1 : i32, i32, i32
  }
  func.func @transform_8(%arg0: i32) -> (i32, i32, i32) {
    %c0_i32 = arith.constant 0 : i32
    %c0_i32_0 = arith.constant 0 : i32
    %c0_i32_1 = arith.constant 0 : i32
    %c0_i32_2 = arith.constant 0 : i32
    return %c0_i32, %c0_i32_0, %c0_i32_1 : i32, i32, i32
  }
  func.func @transform_9(%arg0: i32) -> (i32, i32, i32) {
    %c0_i32 = arith.constant 0 : i32
    %c0_i32_0 = arith.constant 0 : i32
    %c0_i32_1 = arith.constant 0 : i32
    %c0_i32_2 = arith.constant 0 : i32
    return %c0_i32, %c0_i32_0, %c0_i32_1 : i32, i32, i32
  }
  func.func @transform_10(%arg0: i32) -> (i32, i32, i32) {
    %c0_i32 = arith.constant 0 : i32
    %c0_i32_0 = arith.constant 0 : i32
    %c0_i32_1 = arith.constant 0 : i32
    %c0_i32_2 = arith.constant 0 : i32
    return %c0_i32, %c0_i32_0, %c0_i32_1 : i32, i32, i32
  }
  func.func @transform_11(%arg0: i32) -> (i32, i32, i32) {
    %c0_i32 = arith.constant 0 : i32
    %c0_i32_0 = arith.constant 0 : i32
    %c0_i32_1 = arith.constant 0 : i32
    %c0_i32_2 = arith.constant 0 : i32
    return %c0_i32, %c0_i32_0, %c0_i32_1 : i32, i32, i32
  }
  func.func @transform_12(%arg0: i32) -> (i32, i32, i32) {
    %c0_i32 = arith.constant 0 : i32
    %c0_i32_0 = arith.constant 0 : i32
    %c0_i32_1 = arith.constant 0 : i32
    %c0_i32_2 = arith.constant 0 : i32
    return %c0_i32, %c0_i32_0, %c0_i32_1 : i32, i32, i32
  }
  func.func @transform_13(%arg0: i32) -> (i32, i32) {
    %c0_i32 = arith.constant 0 : i32
    %c0_i32_0 = arith.constant 0 : i32
    %c0_i32_1 = arith.constant 0 : i32
    return %c0_i32, %c0_i32_0 : i32, i32
  }
  func.func @transform_14(%arg0: i32) -> (i32, i32) {
    %c0_i32 = arith.constant 0 : i32
    %c0_i32_0 = arith.constant 0 : i32
    %c0_i32_1 = arith.constant 0 : i32
    return %c0_i32, %c0_i32_0 : i32, i32
  }
  func.func @transform_15(%arg0: i32) -> (i32, i32, i32) {
    %c0_i32 = arith.constant 0 : i32
    %c0_i32_0 = arith.constant 0 : i32
    %c0_i32_1 = arith.constant 0 : i32
    return %arg0, %c0_i32, %c0_i32_0 : i32, i32, i32
  }
}

</mosaic_0001>

<bundles_post_ra>
// kernel: tpu_custom_call.1
= control target key start
LH: loop header
LB: loop body
LE: loop exit
PB: predicated region body
PF: predicated region fallthrough
CT: control target
= control target key end

     0   :  { %s3415_s0 = inlined_call_operand.vmem [shape: f32[2,16,32], index: 0, kind: input, shape index: {}]   ;;  %s3416_s1 = inlined_call_operand.vmem [shape: f32[16,32], index: 1, kind: input, shape index: {}]   ;;  %s3417_s2 = inlined_call_operand.vmem [shape: f32[2,1,32], index: 2, kind: input, shape index: {}]   ;;  %s3418_s3 = inlined_call_operand.vmem [shape: f32[2,1,32], index: 3, kind: input, shape index: {}]   ;;  %s3419_s4 = inlined_call_operand.vmem [shape: f32[2,32,96], index: 4, kind: input, shape index: {}]   ;;  %s3420_s5 = inlined_call_operand.vmem [shape: f32[2,32,32], index: 5, kind: input, shape index: {}]   ;;  %s3421_s6 = inlined_call_operand.vmem [shape: f32[2,1,32], index: 6, kind: input, shape index: {}]   ;;  %s3422_s7 = inlined_call_operand.vmem [shape: f32[2,1,32], index: 7, kind: input, shape index: {}]   ;;  %s3423_s8 = inlined_call_operand.vmem [shape: f32[2,1,32], index: 8, kind: input, shape index: {}]   ;;  %s3424_s9 = inlined_call_operand.vmem [shape: f32[2,32,128], index: 9, kind: input, shape index: {}]   ;;  %s3425_s10 = inlined_call_operand.vmem [shape: f32[2,1,128], index: 10, kind: input, shape index: {}]   ;;  %s3426_s11 = inlined_call_operand.vmem [shape: f32[2,128,32], index: 11, kind: input, shape index: {}]   ;;  %s3427_s12 = inlined_call_operand.vmem [shape: f32[2,1,32], index: 12, kind: input, shape index: {}]   ;;  %s3428_s13 = inlined_call_operand.vmem [shape: f32[1,32], index: 13, kind: input, shape index: {}]   ;;  %s3429_s14 = inlined_call_operand.vmem [shape: f32[1,32], index: 14, kind: input, shape index: {}]   ;;  %s3430_s15 = inlined_call_operand.hbm [shape: f32[2,16,32], index: 15, kind: output, shape index: {}]  }
   0x1   :  { %3452 = sst [smem:[#allocation8_spill]] %s3415_s0 }
   0x2   :  { %3453 = sst [smem:[#allocation9_spill]] %s3416_s1 }
   0x3   :  { %20 = vsyncpa [#allocation3], 0 }
   0x4   :  { %22 = vsyncpa [#allocation3 + $0x1], 0  ;;  %s2804_s18 = smov 0   ;;  %s2806_s19 = smov 0  }
   0x5   :  { %s2808_s20 = smov 0   ;;  %s2810_s21 = smov 0  }
   0x6 LB: > { %3454 = sst [smem:[#allocation5_spill]] %s2704_s20  ;;  %s2825_s22 = sadd.s32 4294967295, %s2708_s21   ;;  %s2708_s21 = sphi %s2810_s21, %s3472_s21   ;;  %s2704_s20 = sphi %s2808_s20, %s3474_s20   ;;  %s2700_s19 = sphi %s2806_s19, %s3476_s19   ;;  %s2696_s18 = sphi %s2804_s18, %s3475_s18  }
   0x7   : > { %s2318_s23 = sadd.s32 4294967294, %s2708_s21   ;;  %s2829_s24 = sadd.s32 1, %s2708_s21  }
   0x8   : > { %3455 = sst [smem:[#allocation6_spill]] %s2829_s24  ;;  %s355_s25 = sadd.s32 1, %s2704_s20 }
   0x9   : > { %s352_s26 = ssub.s32 %s2708_s21, %s2829_s24  ;;  %p365_p0 = scmp.ne.s32.totalorder %s2704_s20, %s2700_s19 }
   0xa   : > { %p353_p1 = scmp.eq.s32.totalorder %s352_s26, 0  ;;  %p366_p2 = scmp.eq.s32.totalorder %s2825_s22, 1 }
   0xb   : > { %p371_p3 = scmp.ne.s32.totalorder %s2700_s19, %s2696_s18  ;;  %p372_p4 = scmp.eq.s32.totalorder %s2318_s23, 1 }
   0xc   : > { %s2840_s27 = scalar_select %p353_p1, %s2704_s20, %s355_s25  }
   0xd   : > { %p2842_p5 = por %p366_p2, %p365_p0  ;;  %p2846_p6 = por %p372_p4, %p371_p3 }
   0xe   : > { %3456 = sst [smem:[#allocation7_spill]] %s2840_s27  ;;  %p2321_p7 = scmp.ge.s32.totalorder %s2708_s21, 1 }
   0xf   : > { %p440_p8 = scmp.lt.s32.totalorder %s2708_s21, 3 }
  0x11   : > { %p441_p9 = pnand %p2321_p7, %p440_p8 }
  0x12   : > { %p488_p10 = scmp.lt.s32.totalorder (!%p441_p9), %s2825_s22, 1  ;;  %s3459_s1 = sld [smem:[#allocation9_spill]] (!%p441_p9) }
  0x13   : > { %444 = sbr.rel (%p441_p9) target bundleno = 4929 (0x1341), region = 80  ;;  %s3460_s0 = sld [smem:[#allocation8_spill]] (!%p441_p9) }
  0x14   : > { %s3447_s17 = smov (!%p441_p9), 88   ;;  %s3445_s23 = smov (!%p441_p9), 120  }
  0x15   : > { %s3442_s25 = smov (!%p441_p9), 72   ;;  %s3434_s26 = smov (!%p441_p9), 104  }
  0x16   : > { %s3438_s20 = smov (!%p441_p9), 112   ;;  %s3437_s24 = smov (!%p441_p9), 56  }
  0x18   : > { %s489_s30 = scalar_select %p488_p10, %s2825_s22, 1  ;;  %v495_v0 = vld [vmem:[%s3459_s1] sm:$0xff]  ;;  %vm501_vm0 = vcmask 261120   ;;  %v496_v4 = vld [vmem:[%s3459_s1 + $0x8] sm:$0xff]  ;;  %v2710_v8 = vmov 32.0   ;;  %v566_v25 = vld [vmem:[%s3419_s4 + $0x18] sm:$0xff] }
  0x19   : > { %2552 = vrcp.f32 %v2710_v8  ;;  %585 = vmatpush.msra.mxu0 %v566_v25  ;;  %v565_v26 = vld [vmem:[%s3419_s4 + $0x10] sm:$0xff]  ;;  %v564_v27 = vld [vmem:[%s3419_s4 + $0x8] sm:$0xff]  ;;  %v563_v28 = vld [vmem:[%s3419_s4] sm:$0xff]  ;;  %vm606_vm8 = vcmask 64512   ;;  %vm638_vm9 = vcmask 130048  }
  0x1a   : > { %s2441_s16 = sshll.u32 %s489_s30, 4  ;;  %v2536_v43 = vld [vmem:[%s3417_s2] ss:$0 sm:$0xff]  ;;  %s3450_s30 = smov 96  }
  0x1b   : > { %s492_s27 = scalar_lea.vmem %s3460_s0, %s2441_s16  ;;  %586 = vmatpush.msra.mxu0 %v565_v26  ;;  %v2537_v47 = vld [vmem:[%s3418_s3] ss:$0 sm:$0xff]  ;;  %s3449_s16 = smov 64  }
  0x1c   : > { %v493_v1 = vld [vmem:[%s492_s27] sm:$0xff]  ;;  %v494_v3 = vld [vmem:[%s492_s27 + $0x8] sm:$0xff]  ;;  %s3440_s27 = smov 80   ;;  %s3468_s0 = smov 104  }
  0x1d   : > { %v2860_v2 = vadd.f32 %v495_v0, %v493_v1  ;;  %v2867_v6 = vadd.f32 %v496_v4, %v494_v3  ;;  %587 = vmatpush.msra.mxu0 %v564_v27 }
  0x1f   : > { %v502_v5 = vsel %vm501_vm0, %v2860_v2, 0.0  ;;  %v505_v7 = vsel %vm501_vm0, %v2867_v6, 0.0  ;;  %v2553_v9 = vpop.eup %2552  ;;  %588 = vmatpush.msra.mxu0 %v563_v28 }
  0x20   : > { %503 = vadd.xlane.f32.xlu0 %v502_v5  ;;  %v509_v10 = vmul.f32 32.0, %v2553_v9  ;;  %vm513_vm1 = vweird.f32 %v2553_v9 }
  0x22   : > { %v510_v11 = vsub.f32 1.0, %v509_v10 }
  0x24   : > { %v511_v12 = vmul.f32 %v2553_v9, %v510_v11 }
  0x26   : > { %v512_v13 = vadd.f32 %v2553_v9, %v511_v12 }
  0x28   : > { %506 = vadd.xlane.f32.xlu0 %v505_v7  ;;  %v2871_v14 = vsel %vm513_vm1, %v2553_v9, %v512_v13  ;;  %v596_v7 = vld [vmem:[%s3420_s5] sm:$0xff] }
  0x29   : > { %842 = vmatpush.msra.mxu1 %v596_v7 }
  0x93   : > { %v504_v15 = vpop.xlane.xlu0 %503 }
  0x94   : > { %v515_v16 = vmul.f32 %v2871_v14, %v504_v15 }
  0x96   : > { %v517_v17 = vsub.f32 %v2860_v2, %v515_v16 }
  0x98   : > { %v519_v18 = vmul.f32 %v517_v17, %v517_v17 }
  0x9a   : > { %v521_v19 = vsel %vm501_vm0, %v519_v18, 0.0 }
  0x9b   : > { %522 = vadd.xlane.f32.xlu1 %v521_v19  ;;  %v507_v20 = vpop.xlane.xlu0 %506 }
  0x9c   : > { %v516_v21 = vmul.f32 %v2871_v14, %v507_v20 }
  0x9e   : > { %v518_v22 = vsub.f32 %v2867_v6, %v516_v21 }
  0xa0   : > { %v520_v23 = vmul.f32 %v518_v22, %v518_v22 }
  0xa2   : > { %v524_v24 = vsel %vm501_vm0, %v520_v23, 0.0 }
  0xa3   : > { %525 = vadd.xlane.f32.xlu1 %v524_v24 }
 0x10e   : > { %v523_v29 = vpop.xlane.xlu1 %522 }
 0x10f   : > { %v527_v30 = vmul.f32 %v523_v29, %v2871_v14 }
 0x111   : > { %v529_v31 = vadd.f32 1e-05, %v527_v30 }
 0x113   : > { %2554 = vrsqrt.f32 %v529_v31  ;;  %vm537_vm3 = vweird.f32 %v529_v31 }
 0x116   : > { %v526_v32 = vpop.xlane.xlu1 %525 }
 0x117   : > { %v528_v33 = vmul.f32 %v526_v32, %v2871_v14 }
 0x119   : > { %v2555_v34 = vpop.eup %2554  ;;  %v530_v35 = vadd.f32 1e-05, %v528_v33 }
 0x11a   : > { %v532_v36 = vmul.f32 %v2555_v34, %v529_v31  ;;  %vm538_vm2 = vweird.f32 %v2555_v34 }
 0x11b   : > { %2556 = vrsqrt.f32 %v530_v35  ;;  %vm539_vm4 = vmor %vm537_vm3, %vm538_vm2  ;;  %vm547_vm6 = vweird.f32 %v530_v35 }
 0x11c   : > { %v533_v37 = vmul.f32 %v2555_v34, %v532_v36 }
 0x11e   : > { %v534_v38 = vmul.f32 0.5, %v533_v37 }
 0x120   : > { %v535_v39 = vsub.f32 1.5, %v534_v38 }
 0x121   : > { %v2557_v40 = vpop.eup %2556 }
 0x122   : > { %v536_v41 = vmul.f32 %v2555_v34, %v535_v39  ;;  %v542_v42 = vmul.f32 %v2557_v40, %v530_v35  ;;  %vm548_vm5 = vweird.f32 %v2557_v40 }
 0x123   : > { %vm549_vm7 = vmor %vm547_vm6, %vm548_vm5 }
 0x124   : > { %v540_v44 = vsel %vm539_vm4, %v2555_v34, %v536_v41  ;;  %v543_v45 = vmul.f32 %v2557_v40, %v542_v42 }
 0x125   : > { %v551_v46 = vmul.f32 %v540_v44, %v517_v17 }
 0x126   : > { %v544_v48 = vmul.f32 0.5, %v543_v45 }
 0x127   : > { %v556_v49 = vmul.f32 %v2536_v43, %v551_v46 }
 0x128   : > { %v545_v50 = vsub.f32 1.5, %v544_v48 }
 0x129   : > { %v561_v51 = vadd.f32 %v2537_v47, %v556_v49 }
 0x12a   : > { %v546_v52 = vmul.f32 %v2557_v40, %v545_v50 }
 0x12b   : > { %2325 = vmatmul.msk.f32.vlgmr.msra.gmra.mxu0 %vm501_vm0, %v561_v51 }
 0x12c   : > { %v550_v53 = vsel %vm549_vm7, %v2557_v40, %v546_v52 }
 0x12d   : > { %v552_v54 = vmul.f32 %v550_v53, %v518_v22 }
 0x12f   : > { %v557_v55 = vmul.f32 %v2536_v43, %v552_v54 }
 0x131   : > { %v562_v56 = vadd.f32 %v2537_v47, %v557_v55 }
 0x133   : > { %2326 = vmatmul.msk.f32.gmra.mxu0 %vm501_vm0, %v562_v56 }
 0x1a8   : > { %v2901_v57 = vpop.f32.mrf.mxu0 }
 0x1b0   : > { %v2903_v58 = vpop.f32.mrf.mxu0 }
 0x1b1   : > { %604 = vrot.lane.b32.xlu2 %v2903_v58, %s3450_s30  ;;  %v2919_v1 = vpack.i.bf16 %v2901_v57, %v2903_v58 }
 0x1b9   : > { %602 = vrot.lane.b32.xlu2 %v2901_v57, %s3450_s30  ;;  %s2666_s30 = scalar_lea.hbm %s3430_s15, 32 }
 0x20b   : > { %v605_v59 = vpop.permute.xlu2 %604 }
 0x20c   : > { %2327 = vmatpush.xpose.msk.msra.mxu3 %vm606_vm8, %v605_v59 }
 0x213   : > { %v603_v60 = vpop.permute.xlu2 %602 }
 0x214   : > { %2328 = vmatpush.xpose.msk.msra.mxu3 %vm606_vm8, %v603_v60 }
 0x217   : > { %2329 = vmatmul.msk.f32.vlgmr.msra.gmra.mxu3 %vm606_vm8, %v2901_v57 }
 0x21f   : > { %2330 = vmatmul.msk.f32.gmra.mxu3 %vm606_vm8, %v2903_v58 }
 0x29a   : > { %v632_v61 = vpop.f32.mrf.mxu3 }
 0x29b   : > { %v639_v62 = vsel %vm638_vm9, %v632_v61, -inf }
 0x29c   : > { %640 = vmax.xlane.f32.xlu0 %v639_v62 }
 0x2a2   : > { %v635_v63 = vpop.f32.mrf.mxu3 }
 0x2a3   : > { %v642_v0 = vsel %vm638_vm9, %v635_v63, -inf }
 0x2a4   : > { %643 = vmax.xlane.f32.xlu1 %v642_v0 }
 0x2b0   : > { %2497 = vrot.lane.b32.xlu0 %v2919_v1, %s3449_s16  ;;  %s3467_s16 = smov 112  }
 0x2b8   : > { %700 = vrot.lane.b32.xlu0 %v2901_v57, %s3447_s17 }
 0x2c0   : > { %696 = vrot.lane.b32.xlu0 %v2901_v57, %s3445_s23 }
 0x2c8   : > { %983 = vrot.lane.b32.xlu0 %v2903_v58, %s3442_s25 }
 0x2d0   : > { %981 = vrot.lane.b32.xlu0 %v2901_v57, %s3442_s25  ;;  %s3466_s25 = smov 80  }
 0x2d8   : > { %977 = vrot.lane.b32.xlu0 %v2901_v57, %s3434_s26 }
 0x30f   : > { %v641_v3 = vpop.xlane.xlu0 %640 }
 0x310   : > { %v645_v4 = vsub.f32 %v632_v61, %v641_v3 }
 0x312   : > { %v647_v5 = vmul.f32 1.442695, %v645_v4 }
 0x314   : > { %2558 = vpow2.f32 %v647_v5 }
 0x317   : > { %v644_v8 = vpop.xlane.xlu1 %643 }
 0x318   : > { %v646_v9 = vsub.f32 %v635_v63, %v644_v8 }
 0x31a   : > { %v2559_v10 = vpop.eup %2558  ;;  %v649_v11 = vmul.f32 1.442695, %v646_v9 }
 0x31b   : > { %v651_v12 = vsel %vm638_vm9, %v2559_v10, 0.0 }
 0x31c   : > { %2560 = vpow2.f32 %v649_v11  ;;  %652 = vadd.xlane.f32.xlu2 %v651_v12 }
 0x322   : > { %v2561_v13 = vpop.eup %2560  ;;  %v2498_v15 = vpop.permute.xlu0 %2497 }
 0x323   : > { %v654_v16 = vsel %vm638_vm9, %v2561_v13, 0.0  ;;  %v2499_v17 = vunpack.i.l.bf16 %v2498_v15  ;;  %v2500_v18 = vunpack.i.h.bf16 %v2498_v15 }
 0x324   : > { %655 = vadd.xlane.f32.xlu1 %v654_v16 }
 0x325   : > { %687 = vmatpush.msra.mxu2 %v2499_v17 }
 0x327   : > { %688 = vmatpush.msra.mxu2 %v2500_v18 }
 0x32a   : > { %v701_v19 = vpop.permute.xlu0 %700 }
 0x332   : > { %v697_v20 = vpop.permute.xlu0 %696 }
 0x334   : > { %856 = vrot.lane.b32.xlu2 %v2903_v58, %s3440_s27 }
 0x33a   : > { %v984_v21 = vpop.permute.xlu0 %983 }
 0x33b   : > { %2351 = vmatpush.xpose.msk.msrb.mxu1 %vm606_vm8, %v984_v21 }
 0x33c   : > { %979 = vrot.lane.b32.xlu2 %v2903_v58, %s3434_s26  ;;  %s3436_s26 = smov 48  }
 0x33d   : > { %702 = vrot.lane.b32.xlu1 %v2903_v58, %s3447_s17  ;;  %s485_s17 = sand.u32 1, %s2700_s19  }
 0x342   : > { %v982_v22 = vpop.permute.xlu0 %981 }
 0x343   : > { %2352 = vmatpush.xpose.msk.msrb.mxu1 %vm606_vm8, %v982_v22 }
 0x345   : > { %698 = vrot.lane.b32.xlu1 %v2903_v58, %s3445_s23  ;;  %s3465_s23 = smov 72  }
 0x34a   : > { %v978_v37 = vpop.permute.xlu0 %977 }
 0x34d   : > { %854 = vrot.lane.b32.xlu1 %v2901_v57, %s3440_s27  ;;  %s3462_s27 = smov 64  }
 0x355   : > { %850 = vrot.lane.b32.xlu1 %v2901_v57, %s3438_s20 }
 0x35d   : > { %852 = vrot.lane.b32.xlu1 %v2903_v58, %s3438_s20  ;;  %s3463_s20 = smov 88  }
 0x38f   : > { %v653_v23 = vpop.xlane.xlu2 %652 }
 0x390   : > { %2562 = vrcp.f32 %v653_v23 }
 0x396   : > { %v2563_v24 = vpop.eup %2562 }
 0x397   : > { %v656_v25 = vpop.xlane.xlu1 %655  ;;  %v659_v26 = vmul.f32 %v2563_v24, %v2559_v10  ;;  %v857_v30 = vpop.permute.xlu2 %856 }
 0x398   : > { %2564 = vrcp.f32 %v656_v25 }
 0x399   : > { %2331 = vmatmul.msk.f32.vlgmr.msra.gmra.mxu2 %vm638_vm9, %v659_v26 }
 0x39e   : > { %v2565_v27 = vpop.eup %2564 }
 0x39f   : > { %v660_v28 = vmul.f32 %v2565_v27, %v2561_v13  ;;  %v980_v38 = vpop.permute.xlu2 %979 }
 0x3a1   : > { %2332 = vmatmul.msk.f32.gmra.mxu2 %vm638_vm9, %v660_v28 }
 0x3af   : > { %v703_v29 = vpop.permute.xlu1 %702 }
 0x3b0   : > { %2333 = vmatpush.xpose.msk.msrb.mxu3 %vm606_vm8, %v703_v29 }
 0x3b4   : > { %2334 = vmatpush.xpose.msk.msrb.mxu3 %vm606_vm8, %v701_v19 }
 0x3b7   : > { %2335 = vmatmul.msk.f32.vlgmr.msrb.gmra.mxu3 %vm606_vm8, %v697_v20  ;;  %v699_v31 = vpop.permute.xlu1 %698 }
 0x3b8   : > { %2343 = vmatpush.xpose.msk.msra.mxu3 %vm606_vm8, %v857_v30 }
 0x3bf   : > { %2336 = vmatmul.msk.f32.gmra.mxu3 %vm606_vm8, %v699_v31  ;;  %v855_v32 = vpop.permute.xlu1 %854 }
 0x3c0   : > { %2344 = vmatpush.xpose.msk.msra.mxu3 %vm606_vm8, %v855_v32 }
 0x3c7   : > { %v851_v33 = vpop.permute.xlu1 %850 }
 0x3c8   : > { %2345 = vmatmul.msk.f32.vlgmr.msra.gmra.mxu3 %vm606_vm8, %v851_v33 }
 0x3cf   : > { %v853_v34 = vpop.permute.xlu1 %852 }
 0x3d0   : > { %2346 = vmatmul.msk.f32.gmra.mxu3 %vm606_vm8, %v853_v34 }
 0x41c   : > { %v690_v35 = vpop.f32.mrf.mxu2 }
 0x41d   : > { %2341 = vmatmul.msk.f32.vlgmr.msra.gmra.mxu1 %vm606_vm8, %v690_v35 }
 0x424   : > { %v693_v36 = vpop.f32.mrf.mxu2 }
 0x425   : > { %2342 = vmatmul.msk.f32.gmra.mxu1 %vm606_vm8, %v693_v36 }
 0x42d   : > { %2353 = vmatmul.msk.f32.vlgmr.msrb.gmra.mxu1 %vm606_vm8, %v978_v37 }
 0x435   : > { %2354 = vmatmul.msk.f32.gmra.mxu1 %vm606_vm8, %v980_v38  ;;  %v597_v38 = vld [vmem:[%s3420_s5 + $0x8] sm:$0xff] }
 0x436   : > { %813 = vmatpush.msrb.mxu0 %v597_v38 }
 0x43a   : > { %v729_v39 = vpop.f32.mrf.mxu3 }
 0x43b   : > { %v735_v40 = vsel %vm638_vm9, %v729_v39, -inf }
 0x43c   : > { %736 = vmax.xlane.f32.xlu0 %v735_v40 }
 0x442   : > { %v732_v41 = vpop.f32.mrf.mxu3 }
 0x443   : > { %v738_v42 = vsel %vm638_vm9, %v732_v41, -inf }
 0x444   : > { %739 = vmax.xlane.f32.xlu1 %v738_v42 }
 0x44b   : > { %v883_v43 = vpop.f32.mrf.mxu3 }
 0x44c   : > { %v889_v44 = vsel %vm638_vm9, %v883_v43, -inf }
 0x44d   : > { %890 = vmax.xlane.f32.xlu0 %v889_v44 }
 0x453   : > { %v886_v45 = vpop.f32.mrf.mxu3 }
 0x454   : > { %v892_v46 = vsel %vm638_vm9, %v886_v45, -inf }
 0x455   : > { %893 = vmax.xlane.f32.xlu1 %v892_v46 }
 0x49a   : > { %v2972_v47 = vpop.f32.mrf.mxu1 }
 0x4a2   : > { %v2974_v48 = vpop.f32.mrf.mxu1 }
 0x4aa   : > { %v1010_v49 = vpop.f32.mrf.mxu1 }
 0x4ab   : > { %v1016_v50 = vsel %vm638_vm9, %v1010_v49, -inf }
 0x4ac   : > { %1017 = vmax.xlane.f32.xlu2 %v1016_v50 }
 0x4af   : > { %v737_v51 = vpop.xlane.xlu0 %736 }
 0x4b0   : > { %v741_v52 = vsub.f32 %v729_v39, %v737_v51 }
 0x4b2   : > { %v743_v53 = vmul.f32 1.442695, %v741_v52  ;;  %v1013_v54 = vpop.f32.mrf.mxu1 }
 0x4b3   : > { %v1019_v55 = vsel %vm638_vm9, %v1013_v54, -inf }
 0x4b4   : > { %2566 = vpow2.f32 %v743_v53  ;;  %1020 = vmax.xlane.f32.xlu2 %v1019_v55 }
 0x4b7   : > { %v740_v56 = vpop.xlane.xlu1 %739 }
 0x4b8   : > { %v742_v57 = vsub.f32 %v732_v41, %v740_v56  ;;  %v598_v41 = vld [vmem:[%s3420_s5 + $0x10] sm:$0xff] }
 0x4b9   : > { %967 = vmatpush.msra.mxu0 %v598_v41 }
 0x4ba   : > { %v2567_v58 = vpop.eup %2566  ;;  %v745_v59 = vmul.f32 1.442695, %v742_v57 }
 0x4bb   : > { %v747_v60 = vsel %vm638_vm9, %v2567_v58, 0.0 }
 0x4bc   : > { %2568 = vpow2.f32 %v745_v59  ;;  %748 = vadd.xlane.f32.xlu0 %v747_v60 }
 0x4c0   : > { %v891_v61 = vpop.xlane.xlu0 %890 }
 0x4c1   : > { %v895_v62 = vsub.f32 %v883_v43, %v891_v61 }
 0x4c2   : > { %v2569_v63 = vpop.eup %2568 }
 0x4c3   : > { %v897_v0 = vmul.f32 1.442695, %v895_v62  ;;  %v750_v3 = vsel %vm638_vm9, %v2569_v63, 0.0 }
 0x4c4   : > { %751 = vadd.xlane.f32.xlu1 %v750_v3 }
 0x4c5   : > { %2570 = vpow2.f32 %v897_v0 }
 0x4c8   : > { %v894_v10 = vpop.xlane.xlu1 %893 }
 0x4c9   : > { %v896_v15 = vsub.f32 %v886_v45, %v894_v10 }
 0x4cb   : > { %v2571_v4 = vpop.eup %2570  ;;  %v899_v18 = vmul.f32 1.442695, %v896_v15 }
 0x4cc   : > { %2502 = vrot.lane.b32.xlu2 %v2919_v1, %s3437_s24  ;;  %v901_v5 = vsel %vm638_vm9, %v2571_v4, 0.0  ;;  %s3464_s24 = smov 120  }
 0x4cd   : > { %902 = vadd.xlane.f32.xlu1 %v901_v5  ;;  %v2538_v5 = vld [vmem:[%s3421_s6] ss:$0 sm:$0xff] }
 0x4d4   : > { %2512 = vrot.lane.b32.xlu2 %v2919_v1, %s3436_s26  ;;  %s3444_s26 = smov 40  }
 0x51f   : > { %v1018_v7 = vpop.xlane.xlu2 %1017 }
 0x520   : > { %v1022_v8 = vsub.f32 %v1010_v49, %v1018_v7 }
 0x522   : > { %v1024_v9 = vmul.f32 1.442695, %v1022_v8 }
 0x524   : > { %2572 = vpow2.f32 %v1024_v9 }
 0x527   : > { %v1021_v11 = vpop.xlane.xlu2 %1020 }
 0x528   : > { %v1023_v12 = vsub.f32 %v1013_v54, %v1021_v11 }
 0x52a   : > { %v2573_v13 = vpop.eup %2572  ;;  %v1026_v16 = vmul.f32 1.442695, %v1023_v12 }
 0x52b   : > { %v1028_v17 = vsel %vm638_vm9, %v2573_v13, 0.0 }
 0x52c   : > { %2574 = vpow2.f32 %v1026_v16  ;;  %1029 = vadd.xlane.f32.xlu0 %v1028_v17 }
 0x52f   : > { %v2503_v19 = vpop.permute.xlu2 %2502  ;;  %v749_v20 = vpop.xlane.xlu0 %748 }
 0x530   : > { %2576 = vrcp.f32 %v749_v20  ;;  %v2504_v21 = vunpack.i.l.bf16 %v2503_v19  ;;  %v2505_v23 = vunpack.i.h.bf16 %v2503_v19 }
 0x531   : > { %2578 = vpow2.f32 %v899_v18 }
 0x532   : > { %v2575_v22 = vpop.eup %2574  ;;  %783 = vmatpush.msrb.mxu2 %v2504_v21 }
 0x533   : > { %v1031_v24 = vsel %vm638_vm9, %v2575_v22, 0.0 }
 0x534   : > { %784 = vmatpush.msrb.mxu2 %v2505_v23  ;;  %1032 = vadd.xlane.f32.xlu1 %v1031_v24 }
 0x536   : > { %v2577_v25 = vpop.eup %2576 }
 0x537   : > { %v2513_v26 = vpop.permute.xlu2 %2512  ;;  %v752_v27 = vpop.xlane.xlu1 %751  ;;  %v755_v28 = vmul.f32 %v2577_v25, %v2567_v58  ;;  %v1171_v25 = vld [vmem:[%s3424_s9 + $0x18] sm:$0xff] }
 0x538   : > { %v2579_v29 = vpop.eup %2578  ;;  %v2514_v30 = vunpack.i.l.bf16 %v2513_v26  ;;  %2580 = vrcp.f32 %v752_v27  ;;  %v2515_v31 = vunpack.i.h.bf16 %v2513_v26  ;;  %v1170_v26 = vld [vmem:[%s3424_s9 + $0x10] sm:$0xff]  ;;  %v1169_v27 = vld [vmem:[%s3424_s9 + $0x8] sm:$0xff] }
 0x539   : > { %2337 = vmatmul.msk.f32.vlgmr.msrb.gmra.mxu2 %vm638_vm9, %v755_v28  ;;  %v904_v32 = vsel %vm638_vm9, %v2579_v29, 0.0  ;;  %v1168_v28 = vld [vmem:[%s3424_s9] sm:$0xff] }
 0x53a   : > { %937 = vmatpush.msra.mxu2 %v2514_v30 }
 0x53c   : > { %938 = vmatpush.msra.mxu2 %v2515_v31  ;;  %905 = vadd.xlane.f32.xlu1 %v904_v32 }
 0x53e   : > { %v2581_v33 = vpop.eup %2580 }
 0x53f   : > { %v756_v34 = vmul.f32 %v2581_v33, %v2569_v63 }
 0x540   : > { %2507 = vrot.lane.b32.xlu0 %v2919_v1, %s3444_s26  ;;  %v903_v35 = vpop.xlane.xlu1 %902  ;;  %v599_v1 = vld [vmem:[%s3420_s5 + $0x18] sm:$0xff]  ;;  %s3461_s26 = smov 96  }
 0x541   : > { %2582 = vrcp.f32 %v903_v35  ;;  %2338 = vmatmul.msk.f32.gmra.mxu2 %vm638_vm9, %v756_v34 }
 0x542   : > { %1094 = vmatpush.msrb.mxu2 %v599_v1 }
 0x547   : > { %v2583_v36 = vpop.eup %2582 }
 0x548   : > { %v909_v37 = vmul.f32 %v2583_v36, %v2571_v4 }
 0x54a   : > { %2347 = vmatmul.msk.f32.vlgmr.msra.gmra.mxu2 %vm638_vm9, %v909_v37 }
 0x59f   : > { %v1030_v40 = vpop.xlane.xlu0 %1029 }
 0x5a0   : > { %2584 = vrcp.f32 %v1030_v40 }
 0x5a6   : > { %v2585_v44 = vpop.eup %2584 }
 0x5a7   : > { %v1033_v39 = vpop.xlane.xlu1 %1032  ;;  %v1036_v50 = vmul.f32 %v2585_v44, %v2573_v13 }
 0x5af   : > { %v906_v42 = vpop.xlane.xlu1 %905 }
 0x5b0   : > { %2586 = vrcp.f32 %v906_v42  ;;  %v2539_v42 = vld [vmem:[%s3422_s7] ss:$0 sm:$0xff] }
 0x5b1   : > { %2588 = vrcp.f32 %v1033_v39 }
 0x5b2   : > { %v2508_v43 = vpop.permute.xlu0 %2507 }
 0x5b3   : > { %v2509_v45 = vunpack.i.l.bf16 %v2508_v43  ;;  %v2510_v46 = vunpack.i.h.bf16 %v2508_v43 }
 0x5b5   : > { %1064 = vmatpush.msrb.mxu3 %v2509_v45 }
 0x5b6   : > { %v2587_v49 = vpop.eup %2586 }
 0x5b7   : > { %1065 = vmatpush.msrb.mxu3 %v2510_v46  ;;  %v910_v51 = vmul.f32 %v2587_v49, %v2579_v29  ;;  %v2589_v52 = vpop.eup %2588  ;;  %v2540_v46 = vld [vmem:[%s3423_s8] ss:$0 sm:$0xff] }
 0x5b8   : > { %2355 = vmatmul.msk.f32.vlgmr.msrb.gmra.mxu3 %vm638_vm9, %v1036_v50  ;;  %v1037_v54 = vmul.f32 %v2589_v52, %v2575_v22 }
 0x5b9   : > { %2348 = vmatmul.msk.f32.gmra.mxu2 %vm638_vm9, %v910_v51 }
 0x5bc   : > { %v786_v53 = vpop.f32.mrf.mxu2 }
 0x5bd   : > { %2339 = vmatmul.msk.f32.vlgmr.msrb.gmra.mxu0 %vm606_vm8, %v786_v53 }
 0x5be   : > { %1194 = vmatpush.msrb.mxu0 %v1171_v25  ;;  %v1296_v25 = vld [vmem:[%s3426_s11 + $0x18] sm:$0xff] }
 0x5c0   : > { %2356 = vmatmul.msk.f32.gmra.mxu3 %vm638_vm9, %v1037_v54  ;;  %1195 = vmatpush.msrb.mxu0 %v1170_v26 }
 0x5c2   : > { %1196 = vmatpush.msrb.mxu0 %v1169_v27 }
 0x5c4   : > { %v789_v55 = vpop.f32.mrf.mxu2  ;;  %1197 = vmatpush.msrb.mxu0 %v1168_v28 }
 0x5c5   : > { %2340 = vmatmul.msk.f32.gmra.mxu0 %vm606_vm8, %v789_v55 }
 0x5cd   : > { %v940_v56 = vpop.f32.mrf.mxu2 }
 0x5ce   : > { %2349 = vmatmul.msk.f32.vlgmr.msra.gmra.mxu0 %vm606_vm8, %v940_v56 }
 0x63a   : > { %v815_v60 = vpop.f32.mrf.mxu0 }
 0x63b   : > { %v1067_v57 = vpop.f32.mrf.mxu3  ;;  %v845_v63 = vadd.f32 %v2972_v47, %v815_v60  ;;  %v1306_v60 = vld [vmem:[%s3426_s11 + $0x68] sm:$0xff] }
 0x63c   : > { %v943_v58 = vpop.f32.mrf.mxu2  ;;  %2357 = vmatmul.msk.f32.vlgmr.msrb.gmra.mxu2 %vm606_vm8, %v1067_v57 }
 0x63d   : > { %2350 = vmatmul.msk.f32.gmra.mxu0 %vm606_vm8, %v943_v58  ;;  %v1308_v58 = vld [vmem:[%s3426_s11 + $0x78] sm:$0xff] }
 0x63e   : > { %1309 = vmatpush.msra.mxu1 %v1308_v58 }
 0x642   : > { %v818_v61 = vpop.f32.mrf.mxu0 }
 0x643   : > { %v1070_v59 = vpop.f32.mrf.mxu3  ;;  %v848_v9 = vadd.f32 %v2974_v48, %v818_v61  ;;  %v2541_v61 = vld [vmem:[%s3425_s10] ss:$0 sm:$0xff] }
 0x644   : > { %2358 = vmatmul.msk.f32.gmra.mxu2 %vm606_vm8, %v1070_v59  ;;  %v1307_v59 = vld [vmem:[%s3426_s11 + $0x70] sm:$0xff] }
 0x645   : > { %1310 = vmatpush.msra.mxu1 %v1307_v59 }
 0x647   : > { %1311 = vmatpush.msra.mxu1 %v1306_v60 }
 0x64b   : > { %v969_v62 = vpop.f32.mrf.mxu0 }
 0x64c   : > { %v975_v0 = vadd.f32 %v969_v62, %v845_v63  ;;  %v1305_v62 = vld [vmem:[%s3426_s11 + $0x60] sm:$0xff]  ;;  %v1304_v63 = vld [vmem:[%s3426_s11 + $0x58] sm:$0xff] }
 0x64d   : > { %1312 = vmatpush.msra.mxu1 %v1305_v62 }
 0x64f   : > { %1313 = vmatpush.msra.mxu1 %v1304_v63 }
 0x6ba   : > { %v972_v8 = vpop.f32.mrf.mxu0 }
 0x6bb   : > { %v976_v11 = vadd.f32 %v972_v8, %v848_v9  ;;  %v1301_v9 = vld [vmem:[%s3426_s11 + $0x40] sm:$0xff] }
 0x6bf   : > { %v1096_v3 = vpop.f32.mrf.mxu2 }
 0x6c0   : > { %v1102_v4 = vadd.f32 %v1096_v3, %v975_v0 }
 0x6c2   : > { %v1104_v7 = vadd.f32 %v1102_v4, %v2860_v2  ;;  %v1303_v4 = vld [vmem:[%s3426_s11 + $0x50] sm:$0xff] }
 0x6c3   : > { %1314 = vmatpush.msra.mxu1 %v1303_v4 }
 0x6c4   : > { %v3017_v10 = vadd.f32 %v2538_v5, %v1104_v7  ;;  %v1302_v7 = vld [vmem:[%s3426_s11 + $0x48] sm:$0xff] }
 0x6c5   : > { %1315 = vmatpush.msra.mxu1 %v1302_v7 }
 0x6c6   : > { %v1114_v12 = vsel %vm501_vm0, %v3017_v10, 0.0 }
 0x6c7   : > { %1115 = vadd.xlane.f32.xlu0 %v1114_v12  ;;  %v1099_v47 = vpop.f32.mrf.mxu2  ;;  %1316 = vmatpush.msra.mxu1 %v1301_v9  ;;  %v1300_v12 = vld [vmem:[%s3426_s11 + $0x38] sm:$0xff] }
 0x6c8   : > { %v1103_v13 = vadd.f32 %v1099_v47, %v976_v11 }
 0x6c9   : > { %1317 = vmatpush.msra.mxu1 %v1300_v12 }
 0x6ca   : > { %v1105_v15 = vadd.f32 %v1103_v13, %v2867_v6 }
 0x6cc   : > { %v3022_v16 = vadd.f32 %v2538_v5, %v1105_v15 }
 0x6ce   : > { %v1117_v17 = vsel %vm501_vm0, %v3022_v16, 0.0 }
 0x6cf   : > { %1118 = vadd.xlane.f32.xlu2 %v1117_v17 }
 0x73a   : > { %v1116_v2 = vpop.xlane.xlu0 %1115 }
 0x73b   : > { %v1120_v48 = vmul.f32 %v1116_v2, %v2871_v14  ;;  %v1299_v2 = vld [vmem:[%s3426_s11 + $0x30] sm:$0xff] }
 0x73c   : > { %1318 = vmatpush.msra.mxu1 %v1299_v2 }
 0x73d   : > { %v1122_v18 = vsub.f32 %v3017_v10, %v1120_v48 }
 0x73f   : > { %v1124_v19 = vmul.f32 %v1122_v18, %v1122_v18 }
 0x741   : > { %v1126_v20 = vsel %vm501_vm0, %v1124_v19, 0.0  ;;  %v1298_v19 = vld [vmem:[%s3426_s11 + $0x28] sm:$0xff] }
 0x742   : > { %1127 = vadd.xlane.f32.xlu1 %v1126_v20  ;;  %v1119_v21 = vpop.xlane.xlu2 %1118  ;;  %1319 = vmatpush.msra.mxu1 %v1298_v19 }
 0x743   : > { %v1121_v22 = vmul.f32 %v1119_v21, %v2871_v14 }
 0x745   : > { %v1123_v6 = vsub.f32 %v3022_v16, %v1121_v22 }
 0x747   : > { %v1125_v23 = vmul.f32 %v1123_v6, %v1123_v6 }
 0x749   : > { %v1129_v24 = vsel %vm501_vm0, %v1125_v23, 0.0 }
 0x74a   : > { %1130 = vadd.xlane.f32.xlu1 %v1129_v24 }
 0x7b5   : > { %v1128_v29 = vpop.xlane.xlu1 %1127 }
 0x7b6   : > { %v1132_v30 = vmul.f32 %v1128_v29, %v2871_v14  ;;  %v1295_v29 = vld [vmem:[%s3426_s11 + $0x10] sm:$0xff] }
 0x7b8   : > { %v1134_v31 = vadd.f32 1e-05, %v1132_v30 }
 0x7ba   : > { %2590 = vrsqrt.f32 %v1134_v31  ;;  %vm1142_vm11 = vweird.f32 %v1134_v31 }
 0x7bd   : > { %v1131_v32 = vpop.xlane.xlu1 %1130 }
 0x7be   : > { %v1133_v33 = vmul.f32 %v1131_v32, %v2871_v14 }
 0x7c0   : > { %v2591_v34 = vpop.eup %2590  ;;  %v1135_v35 = vadd.f32 1e-05, %v1133_v33  ;;  %v1294_v33 = vld [vmem:[%s3426_s11 + $0x8] sm:$0xff] }
 0x7c1   : > { %v1137_v36 = vmul.f32 %v2591_v34, %v1134_v31  ;;  %vm1143_vm10 = vweird.f32 %v2591_v34 }
 0x7c2   : > { %2592 = vrsqrt.f32 %v1135_v35  ;;  %vm1144_vm12 = vmor %vm1142_vm11, %vm1143_vm10  ;;  %vm1152_vm14 = vweird.f32 %v1135_v35 }
 0x7c3   : > { %v1138_v37 = vmul.f32 %v2591_v34, %v1137_v36  ;;  %v1293_v36 = vld [vmem:[%s3426_s11] sm:$0xff] }
 0x7c5   : > { %v1139_v38 = vmul.f32 0.5, %v1138_v37 }
 0x7c7   : > { %v1140_v39 = vsub.f32 1.5, %v1139_v38 }
 0x7c8   : > { %v2593_v40 = vpop.eup %2592 }
 0x7c9   : > { %v1141_v41 = vmul.f32 %v2591_v34, %v1140_v39  ;;  %v1147_v1 = vmul.f32 %v2593_v40, %v1135_v35  ;;  %vm1153_vm13 = vweird.f32 %v2593_v40 }
 0x7ca   : > { %vm1154_vm15 = vmor %vm1152_vm14, %vm1153_vm13 }
 0x7cb   : > { %v1145_v43 = vsel %vm1144_vm12, %v2591_v34, %v1141_v41  ;;  %v1148_v44 = vmul.f32 %v2593_v40, %v1147_v1 }
 0x7cc   : > { %v1156_v45 = vmul.f32 %v1145_v43, %v1122_v18 }
 0x7cd   : > { %v1149_v49 = vmul.f32 0.5, %v1148_v44 }
 0x7ce   : > { %v1161_v50 = vmul.f32 %v2539_v42, %v1156_v45 }
 0x7cf   : > { %v1150_v51 = vsub.f32 1.5, %v1149_v49 }
 0x7d0   : > { %v1166_v52 = vadd.f32 %v2540_v46, %v1161_v50 }
 0x7d1   : > { %v1151_v53 = vmul.f32 %v2593_v40, %v1150_v51 }
 0x7d2   : > { %2359 = vmatmul.msk.f32.vlgmr.msrb.gmra.mxu0 %vm501_vm0, %v1166_v52 }
 0x7d3   : > { %v1155_v54 = vsel %vm1154_vm15, %v2593_v40, %v1151_v53 }
 0x7d4   : > { %v1157_v55 = vmul.f32 %v1155_v54, %v1123_v6  ;;  %v1297_v6 = vld [vmem:[%s3426_s11 + $0x20] sm:$0xff] }
 0x7d5   : > { %1320 = vmatpush.msra.mxu1 %v1297_v6 }
 0x7d6   : > { %v1162_v56 = vmul.f32 %v2539_v42, %v1157_v55 }
 0x7d7   : > { %1321 = vmatpush.msra.mxu1 %v1296_v25 }
 0x7d8   : > { %v1167_v57 = vadd.f32 %v2540_v46, %v1162_v56 }
 0x7d9   : > { %1322 = vmatpush.msra.mxu1 %v1295_v29 }
 0x7da   : > { %2360 = vmatmul.msk.f32.gmra.mxu0 %vm501_vm0, %v1167_v57 }
 0x7db   : > { %1323 = vmatpush.msra.mxu1 %v1294_v33 }
 0x7dd   : > { %1324 = vmatpush.msra.mxu1 %v1293_v36 }
 0x84f   : > { %v1199_v0 = vpop.f32.mrf.mxu0 }
 0x850   : > { %v3072_v3 = vadd.f32 %v2541_v61, %v1199_v0 }
 0x852   : > { %v3078_v5 = vmul.f32 0.70710677, %v3072_v3  ;;  %v1205_v25 = vmul.f32 0.5, %v3072_v3  ;;  %v2542_v3 = vld [vmem:[%s3427_s12] ss:$0 sm:$0xff] }
 0x854   : > { %v1209_v8 = vmul.f32 %v3078_v5, %v3078_v5 }
 0x856   : > { %v1210_v11 = vmin.f32 %v1209_v8, 16.0 }
 0x857   : > { %v1202_v47 = vpop.f32.mrf.mxu0 }
 0x858   : > { %v1211_v13 = vmul.f32 2.1237322e-06, %v1210_v11  ;;  %v1222_v15 = vmul.f32 3.8918573e-05, %v1210_v11  ;;  %v3091_v17 = vadd.f32 %v2541_v61, %v1202_v47 }
 0x85a   : > { %v1212_v48 = vadd.f32 0.00028619796, %v1211_v13  ;;  %v1223_v18 = vadd.f32 0.001143296, %v1222_v15  ;;  %v3100_v20 = vmul.f32 0.70710677, %v3091_v17 }
 0x85c   : > { %v1213_v21 = vmul.f32 %v1212_v48, %v1210_v11  ;;  %v1224_v22 = vmul.f32 %v1223_v18, %v1210_v11  ;;  %v1249_v23 = vmul.f32 %v3100_v20, %v3100_v20 }
 0x85e   : > { %v1225_v24 = vadd.f32 0.014752088, %v1224_v22  ;;  %v1214_v26 = vadd.f32 0.0036580483, %v1213_v21  ;;  %v1250_v27 = vmin.f32 %v1249_v23, 16.0 }
 0x860   : > { %v1226_v28 = vmul.f32 %v1225_v24, %v1210_v11  ;;  %v1251_v30 = vmul.f32 2.1237322e-06, %v1250_v27  ;;  %v1262_v31 = vmul.f32 3.8918573e-05, %v1250_v27  ;;  %v1215_v34 = vmul.f32 %v1214_v26, %v1210_v11 }
 0x862   : > { %v1227_v32 = vadd.f32 0.112945676, %v1226_v28  ;;  %v1252_v35 = vadd.f32 0.00028619796, %v1251_v30  ;;  %v1263_v37 = vadd.f32 0.001143296, %v1262_v31 }
 0x863   : > { %v1216_v1 = vadd.f32 0.05243302, %v1215_v34  ;;  %v1206_v34 = vmul.f32 0.5, %v3091_v17 }
 0x864   : > { %v1228_v38 = vmul.f32 %v1227_v32, %v1210_v11  ;;  %v1253_v39 = vmul.f32 %v1252_v35, %v1250_v27  ;;  %v1264_v40 = vmul.f32 %v1263_v37, %v1250_v27 }
 0x865   : > { %v1217_v49 = vmul.f32 %v1216_v1, %v1210_v11 }
 0x866   : > { %v1229_v41 = vadd.f32 0.4994258, %v1228_v38  ;;  %v1265_v42 = vadd.f32 0.014752088, %v1264_v40  ;;  %v1254_v44 = vadd.f32 0.0036580483, %v1253_v39 }
 0x867   : > { %v1218_v53 = vadd.f32 0.18741608, %v1217_v49 }
 0x868   : > { %v1230_v43 = vmul.f32 %v1229_v41, %v1210_v11  ;;  %v1266_v45 = vmul.f32 %v1265_v42, %v1250_v27  ;;  %v1255_v51 = vmul.f32 %v1254_v44, %v1250_v27 }
 0x869   : > { %v1219_v58 = vmul.f32 %v1218_v53, %v1210_v11  ;;  %v2367_v53 = vld [vmem:[%s3419_s4 + $0x30] sm:$0xff] }
 0x86a   : > { %v1231_v46 = vadd.f32 1.0, %v1230_v43  ;;  %v1267_v50 = vadd.f32 0.112945676, %v1266_v45  ;;  %v1256_v55 = vadd.f32 0.05243302, %v1255_v51 }
 0x86b   : > { %v1220_v0 = vadd.f32 1.1283791, %v1219_v58 }
 0x86c   : > { %2594 = vrcp.f32 %v1231_v46  ;;  %v1268_v52 = vmul.f32 %v1267_v50, %v1250_v27  ;;  %v1257_v61 = vmul.f32 %v1256_v55, %v1250_v27  ;;  %v1243_v63 = vand.u32 2147483648, %v1231_v46  ;;  %v2365_v55 = vld [vmem:[%s3419_s4 + $0x20] sm:$0xff] }
 0x86d   : > { %v1241_v7 = vand.u32 2147483647, %v1231_v46  ;;  %vm1237_vm2 = vweird.f32 %v1231_v46  ;;  %v1221_v13 = vmul.f32 %v1220_v0, %v3078_v5 }
 0x86e   : > { %v1269_v54 = vadd.f32 0.4994258, %v1268_v52  ;;  %v1258_v8 = vadd.f32 0.18741608, %v1257_v61  ;;  %v1244_v12 = vor.u32 1.1754944e-38, %v1243_v63  ;;  %v2368_v52 = vld [vmem:[%s3419_s4 + $0x38] sm:$0xff] }
 0x86f   : > { %vm1242_vm4 = vcmp.eq.f32.partialorder %v1241_v7, 8.507059e+37  ;;  %1421 = vmatpush.msra.mxu3 %v2368_v52 }
 0x870   : > { %v1270_v56 = vmul.f32 %v1269_v54, %v1250_v27  ;;  %v1259_v2 = vmul.f32 %v1258_v8, %v1250_v27  ;;  %v2366_v54 = vld [vmem:[%s3419_s4 + $0x28] sm:$0xff] }
 0x871   : > { %1422 = vmatpush.msra.mxu3 %v2367_v53 }
 0x872   : > { %v2595_v57 = vpop.eup %2594  ;;  %v1271_v60 = vadd.f32 1.0, %v1270_v56  ;;  %v1260_v6 = vadd.f32 1.1283791, %v1259_v2  ;;  %v2544_v2 = vld [vmem:[%s3418_s3 + $0x1] ss:$0 sm:$0xff] }
 0x873   : > { %v1233_v59 = vmul.f32 %v2595_v57, %v1231_v46  ;;  %vm1238_vm1 = vweird.f32 %v2595_v57  ;;  %1423 = vmatpush.msra.mxu3 %v2366_v54 }
 0x874   : > { %2596 = vrcp.f32 %v1271_v60  ;;  %vm1239_vm3 = vmor %vm1237_vm2, %vm1238_vm1  ;;  %v1283_v22 = vand.u32 2147483648, %v1271_v60  ;;  %v1281_v24 = vand.u32 2147483647, %v1271_v60  ;;  %vm1277_vm6 = vweird.f32 %v1271_v60 }
 0x875   : > { %v1234_v62 = vsub.f32 1.0, %v1233_v59  ;;  %v1261_v30 = vmul.f32 %v1260_v6, %v3100_v20  ;;  %1424 = vmatpush.msra.mxu3 %v2365_v55 }
 0x876   : > { %v1284_v5 = vor.u32 1.1754944e-38, %v1283_v22  ;;  %vm1282_vm10 = vcmp.eq.f32.partialorder %v1281_v24, 8.507059e+37 }
 0x877   : > { %v1235_v4 = vmul.f32 %v2595_v57, %v1234_v62 }
 0x879   : > { %v1236_v9 = vadd.f32 %v2595_v57, %v1235_v4 }
 0x87a   : > { %v2597_v47 = vpop.eup %2596 }
 0x87b   : > { %v1240_v15 = vsel %vm1239_vm3, %v2595_v57, %v1236_v9  ;;  %v1273_v48 = vmul.f32 %v2597_v47, %v1271_v60  ;;  %vm1278_vm5 = vweird.f32 %v2597_v47 }
 0x87c   : > { %v1245_v11 = vsel %vm1242_vm4, %v1244_v12, %v1240_v15  ;;  %vm1279_vm7 = vmor %vm1277_vm6, %vm1278_vm5  ;;  %v2543_v12 = vld [vmem:[%s3417_s2 + $0x1] ss:$0 sm:$0xff] }
 0x87d   : > { %v1246_v18 = vmul.f32 %v1245_v11, %v1221_v13  ;;  %v1274_v19 = vsub.f32 1.0, %v1273_v48 }
 0x87f   : > { %v2361_v21 = vclamps-f32 %v1246_v18, 1.0  ;;  %v1275_v23 = vmul.f32 %v2597_v47, %v1274_v19 }
 0x881   : > { %v1289_v26 = vadd.f32 1.0, %v2361_v21  ;;  %v1276_v28 = vadd.f32 %v2597_v47, %v1275_v23 }
 0x883   : > { %v1291_v29 = vmul.f32 %v1289_v26, %v1205_v25  ;;  %v1280_v27 = vsel %vm1279_vm7, %v2597_v47, %v1276_v28 }
 0x884   : > { %v1285_v31 = vsel %vm1282_vm10, %v1284_v5, %v1280_v27 }
 0x885   : > { %1325 = vmatmul.f32.vlgmr.msra.gmra.mxu1 %v1291_v29  ;;  %v1286_v32 = vmul.f32 %v1285_v31, %v1261_v30 }
 0x887   : > { %v2362_v33 = vclamps-f32 %v1286_v32, 1.0 }
 0x889   : > { %v1290_v35 = vadd.f32 1.0, %v2362_v33 }
 0x88b   : > { %v1292_v36 = vmul.f32 %v1290_v35, %v1206_v34 }
 0x88d   : > { %1328 = vmatmul.f32.gmra.mxu1 %v1292_v36 }
 0x902   : > { %v1326_v37 = vpop.f32.mrf.mxu1 }
 0x903   : > { %v1332_v38 = vadd.f32 %v1326_v37, %v3017_v10 }
 0x905   : > { %v3127_v39 = vadd.f32 %v2542_v3, %v1332_v38 }
 0x907   : > { %v1344_v20 = vsel %vm501_vm0, %v3127_v39, 0.0 }
 0x908   : > { %1345 = vadd.xlane.f32.xlu1 %v1344_v20 }
 0x90a   : > { %v1329_v40 = vpop.f32.mrf.mxu1 }
 0x90b   : > { %v1333_v41 = vadd.f32 %v1329_v40, %v3022_v16 }
 0x90d   : > { %v3132_v17 = vadd.f32 %v2542_v3, %v1333_v41 }
 0x90f   : > { %v1347_v1 = vsel %vm501_vm0, %v3132_v17, 0.0 }
 0x910   : > { %1348 = vadd.xlane.f32.xlu1 %v1347_v1 }
 0x97b   : > { %v1346_v42 = vpop.xlane.xlu1 %1345 }
 0x97c   : > { %v1350_v43 = vmul.f32 %v1346_v42, %v2871_v14  ;;  %v2371_v42 = vld [vmem:[%s3420_s5 + $0x20] sm:$0xff] }
 0x97d   : > { %1677 = vmatpush.msrb.mxu1 %v2371_v42 }
 0x97e   : > { %v1352_v10 = vsub.f32 %v3127_v39, %v1350_v43 }
 0x980   : > { %v1354_v44 = vmul.f32 %v1352_v10, %v1352_v10 }
 0x982   : > { %v1356_v45 = vsel %vm501_vm0, %v1354_v44, 0.0 }
 0x983   : > { %1357 = vadd.xlane.f32.xlu1 %v1356_v45  ;;  %v1349_v46 = vpop.xlane.xlu1 %1348 }
 0x984   : > { %v1351_v49 = vmul.f32 %v1349_v46, %v2871_v14 }
 0x986   : > { %v1353_v16 = vsub.f32 %v3132_v17, %v1351_v49 }
 0x988   : > { %v1355_v50 = vmul.f32 %v1353_v16, %v1353_v16 }
 0x98a   : > { %v1359_v51 = vsel %vm501_vm0, %v1355_v50, 0.0 }
 0x98b   : > { %1360 = vadd.xlane.f32.xlu1 %v1359_v51 }
 0x9f6   : > { %v1358_v56 = vpop.xlane.xlu1 %1357 }
 0x9f7   : > { %v1362_v57 = vmul.f32 %v1358_v56, %v2871_v14 }
 0x9f9   : > { %v1364_v58 = vadd.f32 1e-05, %v1362_v57 }
 0x9fb   : > { %2598 = vrsqrt.f32 %v1364_v58  ;;  %vm1372_vm12 = vweird.f32 %v1364_v58 }
 0x9fe   : > { %v1361_v59 = vpop.xlane.xlu1 %1360 }
 0x9ff   : > { %v1363_v60 = vmul.f32 %v1361_v59, %v2871_v14 }
 0xa01   : > { %v2599_v61 = vpop.eup %2598  ;;  %v1365_v63 = vadd.f32 1e-05, %v1363_v60 }
 0xa02   : > { %v1367_v62 = vmul.f32 %v2599_v61, %v1364_v58  ;;  %vm1373_vm11 = vweird.f32 %v2599_v61 }
 0xa03   : > { %2600 = vrsqrt.f32 %v1365_v63  ;;  %vm1374_vm13 = vmor %vm1372_vm12, %vm1373_vm11  ;;  %vm1382_vm15 = vweird.f32 %v1365_v63 }
 0xa04   : > { %v1368_v0 = vmul.f32 %v2599_v61, %v1367_v62 }
 0xa06   : > { %v1369_v4 = vmul.f32 0.5, %v1368_v0 }
 0xa08   : > { %v1370_v7 = vsub.f32 1.5, %v1369_v4 }
 0xa09   : > { %v2601_v8 = vpop.eup %2600 }
 0xa0a   : > { %v1371_v9 = vmul.f32 %v2599_v61, %v1370_v7  ;;  %v1377_v47 = vmul.f32 %v2601_v8, %v1365_v63  ;;  %vm1383_vm14 = vweird.f32 %v2601_v8 }
 0xa0b   : > { %vm1384_vm1 = vmor %vm1382_vm15, %vm1383_vm14 }
 0xa0c   : > { %v1375_v13 = vsel %vm1374_vm13, %v2599_v61, %v1371_v9  ;;  %v1378_v11 = vmul.f32 %v2601_v8, %v1377_v47 }
 0xa0d   : > { %v1386_v15 = vmul.f32 %v1375_v13, %v1352_v10 }
 0xa0e   : > { %v1379_v18 = vmul.f32 0.5, %v1378_v11 }
 0xa0f   : > { %v1391_v48 = vmul.f32 %v2543_v12, %v1386_v15 }
 0xa10   : > { %v1380_v19 = vsub.f32 1.5, %v1379_v18 }
 0xa11   : > { %v1396_v21 = vadd.f32 %v2544_v2, %v1391_v48 }
 0xa12   : > { %v1381_v22 = vmul.f32 %v2601_v8, %v1380_v19 }
 0xa13   : > { %2369 = vmatmul.msk.f32.vlgmr.msra.gmra.mxu3 %vm501_vm0, %v1396_v21 }
 0xa14   : > { %v1385_v6 = vsel %vm1384_vm1, %v2601_v8, %v1381_v22 }
 0xa15   : > { %v1387_v23 = vmul.f32 %v1385_v6, %v1353_v16 }
 0xa17   : > { %v1392_v24 = vmul.f32 %v2543_v12, %v1387_v23 }
 0xa19   : > { %v1397_v25 = vadd.f32 %v2544_v2, %v1392_v24 }
 0xa1b   : > { %2370 = vmatmul.msk.f32.gmra.mxu3 %vm501_vm0, %v1397_v25 }
 0xa96   : > { %v1426_v26 = vpop.f32.mrf.mxu3 }
 0xa97   : > { %1439 = vrot.lane.b32.xlu0 %v1426_v26, %s3461_s26 }
 0xa9e   : > { %v1429_v28 = vpop.f32.mrf.mxu3 }
 0xa9f   : > { %1441 = vrot.lane.b32.xlu2 %v1429_v28, %s3461_s26  ;;  %v3172_v33 = vpack.i.bf16 %v1426_v26, %v1429_v28  ;;  %s3469_s26 = smov 56  }
 0xaf9   : > { %v1442_v29 = vpop.permute.xlu2 %1441 }
 0xafa   : > { %2375 = vmatpush.xpose.msk.msra.mxu2 %vm606_vm8, %v1442_v29 }
 0xb09   : > { %v1440_v5 = vpop.permute.xlu0 %1439 }
 0xb0a   : > { %2376 = vmatpush.xpose.msk.msra.mxu2 %vm606_vm8, %v1440_v5 }
 0xb0d   : > { %2377 = vmatmul.msk.f32.vlgmr.msra.gmra.mxu2 %vm606_vm8, %v1426_v26 }
 0xb15   : > { %2378 = vmatmul.msk.f32.gmra.mxu2 %vm606_vm8, %v1429_v28 }
 0xb90   : > { %v1468_v30 = vpop.f32.mrf.mxu2 }
 0xb91   : > { %v1474_v27 = vsel %vm638_vm9, %v1468_v30, -inf }
 0xb92   : > { %1475 = vmax.xlane.f32.xlu1 %v1474_v27 }
 0xb98   : > { %v1471_v31 = vpop.f32.mrf.mxu2 }
 0xb99   : > { %v1477_v32 = vsel %vm638_vm9, %v1471_v31, -inf }
 0xb9a   : > { %1478 = vmax.xlane.f32.xlu1 %v1477_v32 }
 0xbb3   : > { %2517 = vrot.lane.b32.xlu1 %v3172_v33, %s3462_s27  ;;  %s3470_s27 = smov 48  }
 0xbbb   : > { %1537 = vrot.lane.b32.xlu1 %v1429_v28, %s3463_s20 }
 0xbc3   : > { %1535 = vrot.lane.b32.xlu1 %v1426_v26, %s3463_s20  ;;  %s3471_s20 = smov 40  }
 0xbcb   : > { %1533 = vrot.lane.b32.xlu1 %v1429_v28, %s3464_s24 }
 0xbd3   : > { %1818 = vrot.lane.b32.xlu1 %v1429_v28, %s3465_s23 }
 0xbdb   : > { %1689 = vrot.lane.b32.xlu1 %v1426_v26, %s3466_s25 }
 0xbe3   : > { %1685 = vrot.lane.b32.xlu1 %v1426_v26, %s3467_s16 }
 0xbeb   : > { %1814 = vrot.lane.b32.xlu1 %v1429_v28, %s3468_s0 }
 0xc05   : > { %v1476_v34 = vpop.xlane.xlu1 %1475 }
 0xc06   : > { %v1480_v35 = vsub.f32 %v1468_v30, %v1476_v34 }
 0xc08   : > { %v1482_v36 = vmul.f32 1.442695, %v1480_v35 }
 0xc0a   : > { %2602 = vpow2.f32 %v1482_v36 }
 0xc0d   : > { %v1479_v3 = vpop.xlane.xlu1 %1478 }
 0xc0e   : > { %v1481_v37 = vsub.f32 %v1471_v31, %v1479_v3 }
 0xc10   : > { %v2603_v38 = vpop.eup %2602  ;;  %v1484_v20 = vmul.f32 1.442695, %v1481_v37 }
 0xc11   : > { %v1486_v40 = vsel %vm638_vm9, %v2603_v38, 0.0 }
 0xc12   : > { %2604 = vpow2.f32 %v1484_v20  ;;  %1487 = vadd.xlane.f32.xlu0 %v1486_v40 }
 0xc18   : > { %v2605_v41 = vpop.eup %2604 }
 0xc19   : > { %v1489_v1 = vsel %vm638_vm9, %v2605_v41, 0.0 }
 0xc1a   : > { %1490 = vadd.xlane.f32.xlu2 %v1489_v1 }
 0xc25   : > { %v2518_v43 = vpop.permute.xlu1 %2517 }
 0xc26   : > { %v2519_v10 = vunpack.i.l.bf16 %v2518_v43  ;;  %1531 = vrot.lane.b32.xlu0 %v1426_v26, %s3464_s24  ;;  %v2520_v44 = vunpack.i.h.bf16 %v2518_v43 }
 0xc28   : > { %1522 = vmatpush.msra.mxu0 %v2519_v10 }
 0xc2a   : > { %1523 = vmatpush.msra.mxu0 %v2520_v44 }
 0xc2d   : > { %v1538_v45 = vpop.permute.xlu1 %1537 }
 0xc2e   : > { %1816 = vrot.lane.b32.xlu0 %v1426_v26, %s3465_s23  ;;  %2381 = vmatpush.xpose.msk.msrb.mxu3 %vm606_vm8, %v1538_v45  ;;  %s2322_s23 = sshll.u32 %s485_s17, 4 }
 0xc32   : > { %1691 = vrot.lane.b32.xlu2 %v1429_v28, %s3466_s25  ;;  %s487_s25 = scalar_lea.vmem [#allocation2], %s2322_s23 }
 0xc35   : > { %v1536_v46 = vpop.permute.xlu1 %1535 }
 0xc36   : > { %1687 = vrot.lane.b32.xlu0 %v1429_v28, %s3467_s16  ;;  %2382 = vmatpush.xpose.msk.msrb.mxu3 %vm606_vm8, %v1536_v46  ;;  %s2442_s16 = sshll.u32 %s2825_s22, 4  ;;  %s2241_s22 = scalar_lea.sflag [#allocation3], %s485_s17 }
 0xc3a   : > { %1812 = vrot.lane.b32.xlu2 %v1426_v26, %s3468_s0 }
 0xc3d   : > { %v1534_v49 = vpop.permute.xlu1 %1533 }
 0xc45   : > { %v1819_v16 = vpop.permute.xlu1 %1818 }
 0xc46   : > { %2399 = vmatpush.xpose.msk.msra.mxu1 %vm606_vm8, %v1819_v16 }
 0xc4d   : > { %v1690_v58 = vpop.permute.xlu1 %1689 }
 0xc55   : > { %v1686_v60 = vpop.permute.xlu1 %1685 }
 0xc5d   : > { %v1815_v8 = vpop.permute.xlu1 %1814 }
 0xc85   : > { %v1488_v50 = vpop.xlane.xlu0 %1487 }
 0xc86   : > { %2606 = vrcp.f32 %v1488_v50 }
 0xc8c   : > { %v2607_v51 = vpop.eup %2606 }
 0xc8d   : > { %v1494_v52 = vmul.f32 %v2607_v51, %v2603_v38  ;;  %v1491_v53 = vpop.xlane.xlu2 %1490 }
 0xc8e   : > { %2608 = vrcp.f32 %v1491_v53 }
 0xc8f   : > { %2379 = vmatmul.msk.f32.vlgmr.msra.gmra.mxu0 %vm638_vm9, %v1494_v52 }
 0xc94   : > { %v2609_v54 = vpop.eup %2608 }
 0xc95   : > { %v1692_v55 = vpop.permute.xlu2 %1691  ;;  %v1495_v56 = vmul.f32 %v2609_v54, %v2605_v41 }
 0xc96   : > { %2391 = vmatpush.xpose.msk.msra.mxu3 %vm606_vm8, %v1692_v55 }
 0xc97   : > { %2380 = vmatmul.msk.f32.gmra.mxu0 %vm638_vm9, %v1495_v56 }
 0xc98   : > { %v1532_v57 = vpop.permute.xlu0 %1531 }
 0xc99   : > { %2383 = vmatmul.msk.f32.vlgmr.msrb.gmra.mxu3 %vm606_vm8, %v1532_v57 }
 0xc9a   : > { %2392 = vmatpush.xpose.msk.msra.mxu3 %vm606_vm8, %v1690_v58 }
 0xc9d   : > { %v1813_v0 = vpop.permute.xlu2 %1812 }
 0xca0   : > { %v1817_v59 = vpop.permute.xlu0 %1816 }
 0xca1   : > { %2384 = vmatmul.msk.f32.gmra.mxu3 %vm606_vm8, %v1534_v49  ;;  %2400 = vmatpush.xpose.msk.msra.mxu1 %vm606_vm8, %v1817_v59 }
 0xca8   : > { %v1688_v61 = vpop.permute.xlu0 %1687 }
 0xca9   : > { %2393 = vmatmul.msk.f32.vlgmr.msra.gmra.mxu3 %vm606_vm8, %v1686_v60 }
 0xcb1   : > { %2394 = vmatmul.msk.f32.gmra.mxu3 %vm606_vm8, %v1688_v61 }
 0xd0c   : > { %v1525_v62 = vpop.f32.mrf.mxu0 }
 0xd0d   : > { %2389 = vmatmul.msk.f32.vlgmr.msrb.gmra.mxu1 %vm606_vm8, %v1525_v62 }
 0xd14   : > { %v1528_v63 = vpop.f32.mrf.mxu0 }
 0xd15   : > { %2390 = vmatmul.msk.f32.gmra.mxu1 %vm606_vm8, %v1528_v63 }
 0xd1c   : > { %v1564_v4 = vpop.f32.mrf.mxu3 }
 0xd1d   : > { %2401 = vmatmul.msk.f32.vlgmr.msra.gmra.mxu1 %vm606_vm8, %v1813_v0  ;;  %v1570_v7 = vsel %vm638_vm9, %v1564_v4, -inf }
 0xd1e   : > { %1571 = vmax.xlane.f32.xlu2 %v1570_v7  ;;  %v2373_v7 = vld [vmem:[%s3420_s5 + $0x30] sm:$0xff] }
 0xd24   : > { %v1567_v9 = vpop.f32.mrf.mxu3 }
 0xd25   : > { %2402 = vmatmul.msk.f32.gmra.mxu1 %vm606_vm8, %v1815_v8  ;;  %v1573_v12 = vsel %vm638_vm9, %v1567_v9, -inf }
 0xd26   : > { %1574 = vmax.xlane.f32.xlu0 %v1573_v12 }
 0xd2c   : > { %v1718_v47 = vpop.f32.mrf.mxu3 }
 0xd2d   : > { %v1724_v13 = vsel %vm638_vm9, %v1718_v47, -inf }
 0xd2e   : > { %1725 = vmax.xlane.f32.xlu2 %v1724_v13 }
 0xd34   : > { %v3212_v15 = vpop.f32.mrf.mxu3 }
 0xd35   : > { %v1727_v11 = vsel %vm638_vm9, %v3212_v15, -inf }
 0xd36   : > { %1728 = vmax.xlane.f32.xlu2 %v1727_v11 }
 0xd8a   : > { %v3216_v2 = vpop.f32.mrf.mxu1 }
 0xd91   : > { %v1572_v48 = vpop.xlane.xlu2 %1571 }
 0xd92   : > { %v1576_v18 = vsub.f32 %v1564_v4, %v1572_v48  ;;  %v3218_v19 = vpop.f32.mrf.mxu1  ;;  %v2372_v4 = vld [vmem:[%s3420_s5 + $0x28] sm:$0xff] }
 0xd93   : > { %1648 = vmatpush.msrb.mxu0 %v2372_v4  ;;  %v2546_v4 = vld [vmem:[%s3422_s7 + $0x1] ss:$0 sm:$0xff] }
 0xd94   : > { %v1578_v21 = vmul.f32 1.442695, %v1576_v18 }
 0xd95   : > { %1802 = vmatpush.msra.mxu0 %v2373_v7 }
 0xd96   : > { %2610 = vpow2.f32 %v1578_v21 }
 0xd99   : > { %v1575_v22 = vpop.xlane.xlu0 %1574 }
 0xd9a   : > { %v1577_v6 = vsub.f32 %v1567_v9, %v1575_v22  ;;  %v1845_v23 = vpop.f32.mrf.mxu1 }
 0xd9b   : > { %v1851_v34 = vsel %vm638_vm9, %v1845_v23, -inf }
 0xd9c   : > { %v2611_v24 = vpop.eup %2610  ;;  %v1580_v25 = vmul.f32 1.442695, %v1577_v6 }
 0xd9d   : > { %v1582_v26 = vsel %vm638_vm9, %v2611_v24, 0.0 }
 0xd9e   : > { %2612 = vpow2.f32 %v1580_v25  ;;  %1583 = vadd.xlane.f32.xlu1 %v1582_v26  ;;  %v2374_v25 = vld [vmem:[%s3420_s5 + $0x38] sm:$0xff] }
 0xda1   : > { %v1726_v28 = vpop.xlane.xlu2 %1725 }
 0xda2   : > { %v1730_v29 = vsub.f32 %v1718_v47, %v1726_v28  ;;  %v1848_v5 = vpop.f32.mrf.mxu1 }
 0xda3   : > { %v1854_v30 = vsel %vm638_vm9, %v1848_v5, -inf }
 0xda4   : > { %v2613_v27 = vpop.eup %2612  ;;  %v1732_v31 = vmul.f32 1.442695, %v1730_v29  ;;  %1855 = vmax.xlane.f32.xlu0 %v1854_v30 }
 0xda5   : > { %v1585_v32 = vsel %vm638_vm9, %v2613_v27, 0.0 }
 0xda6   : > { %2614 = vpow2.f32 %v1732_v31  ;;  %1586 = vadd.xlane.f32.xlu2 %v1585_v32  ;;  %1852 = vmax.xlane.f32.xlu1 %v1851_v34 }
 0xda9   : > { %v1729_v3 = vpop.xlane.xlu2 %1728 }
 0xdaa   : > { %v1731_v61 = vsub.f32 %v3212_v15, %v1729_v3 }
 0xdac   : > { %v2615_v35 = vpop.eup %2614  ;;  %v1734_v62 = vmul.f32 1.442695, %v1731_v61 }
 0xdad   : > { %v1736_v36 = vsel %vm638_vm9, %v2615_v35, 0.0 }
 0xdae   : > { %1737 = vadd.xlane.f32.xlu2 %v1736_v36  ;;  %v2545_v36 = vld [vmem:[%s3421_s6 + $0x1] ss:$0 sm:$0xff] }
 0xdb8   : > { %2522 = vrot.lane.b32.xlu0 %v3172_v33, %s3469_s26  ;;  %s2252_s26 = scalar_lea.hbm %s3430_s15, %s2442_s16 }
 0xdc6   : > { %2532 = vrot.lane.b32.xlu2 %v3172_v33, %s3470_s27  ;;  %s2253_s27 = sshll.u32 %s487_s25, 4  ;;  %s2254_s27 = int_to_ptr.vmem [resolvable:$true] %s2253_s27 }
 0xe11   : > { %v1584_v37 = vpop.xlane.xlu1 %1583 }
 0xe17   : > { %v1856_v38 = vpop.xlane.xlu0 %1855 }
 0xe18   : > { %v1858_v20 = vsub.f32 %v1848_v5, %v1856_v38 }
 0xe19   : > { %v1587_v40 = vpop.xlane.xlu2 %1586  ;;  %v1853_v41 = vpop.xlane.xlu1 %1852 }
 0xe1a   : > { %v1861_v1 = vmul.f32 1.442695, %v1858_v20  ;;  %v1857_v42 = vsub.f32 %v1845_v23, %v1853_v41 }
 0xe1c   : > { %2616 = vpow2.f32 %v1861_v1  ;;  %v1859_v43 = vmul.f32 1.442695, %v1857_v42 }
 0xe1e   : > { %2618 = vpow2.f32 %v1859_v43 }
 0xe1f   : > { %2620 = vrcp.f32 %v1584_v37 }
 0xe20   : > { %2622 = vrcp.f32 %v1587_v40 }
 0xe21   : > { %v1738_v44 = vpop.xlane.xlu2 %1737 }
 0xe22   : > { %v2617_v10 = vpop.eup %2616  ;;  %2624 = vrcp.f32 %v1738_v44 }
 0xe23   : > { %v1866_v45 = vsel %vm638_vm9, %v2617_v10, 0.0  ;;  %2626 = vpow2.f32 %v1734_v62 }
 0xe24   : > { %v2619_v46 = vpop.eup %2618  ;;  %1867 = vadd.xlane.f32.xlu0 %v1866_v45 }
 0xe25   : > { %v1863_v49 = vsel %vm638_vm9, %v2619_v46, 0.0  ;;  %v2621_v50 = vpop.eup %2620 }
 0xe26   : > { %1864 = vadd.xlane.f32.xlu1 %v1863_v49  ;;  %v1590_v54 = vmul.f32 %v2621_v50, %v2611_v24  ;;  %v2623_v57 = vpop.eup %2622 }
 0xe27   : > { %v1591_v58 = vmul.f32 %v2623_v57, %v2613_v27 }
 0xe28   : > { %v2625_v59 = vpop.eup %2624 }
 0xe29   : > { %v2533_v52 = vpop.permute.xlu2 %2532  ;;  %v1744_v60 = vmul.f32 %v2625_v59, %v2615_v35  ;;  %v2627_v63 = vpop.eup %2626 }
 0xe2a   : > { %v2523_v16 = vpop.permute.xlu0 %2522  ;;  %v2534_v55 = vunpack.i.l.bf16 %v2533_v52  ;;  %v2535_v56 = vunpack.i.h.bf16 %v2533_v52  ;;  %v1739_v0 = vsel %vm638_vm9, %v2627_v63, 0.0  ;;  %v2413_v52 = vld [vmem:[%s3424_s9 + $0x38] sm:$0xff] }
 0xe2b   : > { %v2524_v51 = vunpack.i.l.bf16 %v2523_v16  ;;  %v2525_v53 = vunpack.i.h.bf16 %v2523_v16 }
 0xe2d   : > { %1618 = vmatpush.msrb.mxu2 %v2524_v51 }
 0xe2f   : > { %1619 = vmatpush.msrb.mxu2 %v2525_v53  ;;  %v2412_v53 = vld [vmem:[%s3424_s9 + $0x30] sm:$0xff] }
 0xe30   : > { %2385 = vmatmul.msk.f32.vlgmr.msrb.gmra.mxu2 %vm638_vm9, %v1590_v54  ;;  %v2411_v54 = vld [vmem:[%s3424_s9 + $0x28] sm:$0xff] }
 0xe31   : > { %1772 = vmatpush.msra.mxu2 %v2534_v55  ;;  %v2410_v55 = vld [vmem:[%s3424_s9 + $0x20] sm:$0xff] }
 0xe33   : > { %1773 = vmatpush.msra.mxu2 %v2535_v56 }
 0xe35   : > { %1929 = vmatpush.msrb.mxu2 %v2374_v25 }
 0xe38   : > { %2386 = vmatmul.msk.f32.gmra.mxu2 %vm638_vm9, %v1591_v58 }
 0xe3f   : > { %2527 = vrot.lane.b32.xlu1 %v3172_v33, %s3471_s20  ;;  %s2255_s20 = sshll.u32 %s2252_s26, 4  ;;  %s2256_s20 = int_to_ptr.hbm [resolvable:$true] %s2255_s20 }
 0xe40   : > { %2395 = vmatmul.msk.f32.vlgmr.msra.gmra.mxu2 %vm638_vm9, %v1744_v60  ;;  %s2660_s24 = sshra.s32 %s2256_s20, 4  ;;  %s2661_s24 = int_to_ptr.hbm [resolvable:$true] %s2660_s24 }
 0xe41   : > { %s2662_s23 = scalar_lea.hbm %s2661_s24, 16  ;;  %p2667_p0 = scmp.lt.s32.totalorder %s2661_s24, %s3430_s15 }
 0xe42   : > { %p2663_p11 = scmp.ne.s32.totalorder %s2661_s24, %s2662_s23  ;;  %p2668_p1 = scmp.lt.s32.totalorder %s2666_s30, %s2662_s23 }
 0xe44   : > { %p2664_p12 = pnand %p2663_p11, %p2842_p5  ;;  %p2669_p2 = por %p2668_p1, %p2667_p0 }
 0xe46   : > { %p2665_p13 = pneg %p2664_p12 }
 0xe48   : > { %p2670_p3 = pnand %p2669_p2, %p2665_p13 }
 0xe69   : > { %1740 = vadd.xlane.f32.xlu1 %v1739_v0 }
 0xe97   : > { %v1868_v8 = vpop.xlane.xlu0 %1867 }
 0xe99   : > { %v1865_v33 = vpop.xlane.xlu1 %1864 }
 0xe9a   : > { %2628 = vrcp.f32 %v1865_v33 }
 0xe9b   : > { %2630 = vrcp.f32 %v1868_v8  ;;  %v2547_v8 = vld [vmem:[%s3423_s8 + $0x1] ss:$0 sm:$0xff] }
 0xea0   : > { %v2629_v12 = vpop.eup %2628 }
 0xea1   : > { %v1871_v11 = vmul.f32 %v2629_v12, %v2619_v46  ;;  %v2631_v48 = vpop.eup %2630 }
 0xea2   : > { %v1872_v21 = vmul.f32 %v2631_v48, %v2617_v10 }
 0xeb1   : > { %v2528_v9 = vpop.permute.xlu1 %2527 }
 0xeb2   : > { %v2529_v47 = vunpack.i.l.bf16 %v2528_v9  ;;  %v2530_v15 = vunpack.i.h.bf16 %v2528_v9 }
 0xeb3   : > { %v1621_v13 = vpop.f32.mrf.mxu2 }
 0xeb4   : > { %2387 = vmatmul.msk.f32.vlgmr.msrb.gmra.mxu0 %vm606_vm8, %v1621_v13  ;;  %1899 = vmatpush.msrb.mxu3 %v2529_v47 }
 0xeb5   : > { %2034 = vmatpush.msrb.mxu0 %v2413_v52 }
 0xeb6   : > { %1900 = vmatpush.msrb.mxu3 %v2530_v15 }
 0xeb7   : > { %2403 = vmatmul.msk.f32.vlgmr.msrb.gmra.mxu3 %vm638_vm9, %v1871_v11  ;;  %2035 = vmatpush.msrb.mxu0 %v2412_v53 }
 0xeb9   : > { %2036 = vmatpush.msrb.mxu0 %v2411_v54  ;;  %v2420_v54 = vld [vmem:[%s3426_s11 + $0x88] sm:$0xff] }
 0xebb   : > { %v1624_v18 = vpop.f32.mrf.mxu2  ;;  %2037 = vmatpush.msrb.mxu0 %v2410_v55 }
 0xebc   : > { %2388 = vmatmul.msk.f32.gmra.mxu0 %vm606_vm8, %v1624_v18 }
 0xebf   : > { %2404 = vmatmul.msk.f32.gmra.mxu3 %vm638_vm9, %v1872_v21 }
 0xec3   : > { %v1775_v22 = vpop.f32.mrf.mxu2 }
 0xec4   : > { %2397 = vmatmul.msk.f32.vlgmr.msra.gmra.mxu0 %vm606_vm8, %v1775_v22 }
 0xedc   : > { %v1741_v6 = vpop.xlane.xlu1 %1740 }
 0xedd   : > { %2632 = vrcp.f32 %v1741_v6 }
 0xee3   : > { %v2633_v23 = vpop.eup %2632 }
 0xee4   : > { %v1745_v24 = vmul.f32 %v2633_v23, %v2627_v63 }
 0xee6   : > { %2396 = vmatmul.msk.f32.gmra.mxu2 %vm638_vm9, %v1745_v24 }
 0xf31   : > { %v1650_v5 = vpop.f32.mrf.mxu0 }
 0xf32   : > { %v1680_v31 = vadd.f32 %v3216_v2, %v1650_v5  ;;  %v2432_v5 = vld [vmem:[%s3426_s11 + $0xe8] sm:$0xff] }
 0xf39   : > { %v1653_v30 = vpop.f32.mrf.mxu0 }
 0xf3a   : > { %v1902_v26 = vpop.f32.mrf.mxu3  ;;  %v1683_v20 = vadd.f32 %v3218_v19, %v1653_v30  ;;  %v3311_v30 = vld [vmem:[%s3425_s10 + $0x1] ss:$0 sm:$0xff] }
 0xf3b   : > { %2405 = vmatmul.msk.f32.vlgmr.msrb.gmra.mxu2 %vm606_vm8, %v1902_v26 }
 0xf41   : > { %v1804_v27 = vpop.f32.mrf.mxu0 }
 0xf42   : > { %v1905_v28 = vpop.f32.mrf.mxu3  ;;  %v1810_v32 = vadd.f32 %v1804_v27, %v1680_v31  ;;  %v2431_v27 = vld [vmem:[%s3426_s11 + $0xe0] sm:$0xff] }
 0xf43   : > { %2406 = vmatmul.msk.f32.gmra.mxu2 %vm606_vm8, %v1905_v28  ;;  %v2434_v28 = vld [vmem:[%s3426_s11 + $0xf8] sm:$0xff] }
 0xf44   : > { %2150 = vmatpush.msrb.mxu1 %v2434_v28 }
 0xf69   : > { %v1778_v29 = vpop.f32.mrf.mxu2 }
 0xf6a   : > { %2398 = vmatmul.msk.f32.gmra.mxu0 %vm606_vm8, %v1778_v29  ;;  %v2433_v29 = vld [vmem:[%s3426_s11 + $0xf0] sm:$0xff] }
 0xf6b   : > { %2151 = vmatpush.msrb.mxu1 %v2433_v29 }
 0xf6d   : > { %2152 = vmatpush.msrb.mxu1 %v2432_v5 }
 0xf6f   : > { %2153 = vmatpush.msrb.mxu1 %v2431_v27 }
 0xfbe   : > { %v1931_v34 = vpop.f32.mrf.mxu2 }
 0xfbf   : > { %v1937_v35 = vadd.f32 %v1931_v34, %v1810_v32  ;;  %v2430_v32 = vld [vmem:[%s3426_s11 + $0xd8] sm:$0xff] }
 0xfc0   : > { %2154 = vmatpush.msrb.mxu1 %v2430_v32 }
 0xfc1   : > { %v1939_v3 = vadd.f32 %v1937_v35, %v3127_v39  ;;  %v2429_v35 = vld [vmem:[%s3426_s11 + $0xd0] sm:$0xff] }
 0xfc2   : > { %2155 = vmatpush.msrb.mxu1 %v2429_v35 }
 0xfc3   : > { %v3261_v37 = vadd.f32 %v2545_v36, %v1939_v3  ;;  %v2428_v3 = vld [vmem:[%s3426_s11 + $0xc8] sm:$0xff] }
 0xfc4   : > { %2156 = vmatpush.msrb.mxu1 %v2428_v3 }
 0xfc5   : > { %v1952_v38 = vsel %vm501_vm0, %v3261_v37, 0.0 }
 0xfc6   : > { %1953 = vadd.xlane.f32.xlu2 %v1952_v38  ;;  %v1934_v2 = vpop.f32.mrf.mxu2 }
 0xfe7   : > { %v1807_v40 = vpop.f32.mrf.mxu0 }
 0xfe8   : > { %v1811_v41 = vadd.f32 %v1807_v40, %v1683_v20  ;;  %v2427_v20 = vld [vmem:[%s3426_s11 + $0xc0] sm:$0xff] }
 0xfe9   : > { %2157 = vmatpush.msrb.mxu1 %v2427_v20 }
 0xfea   : > { %v1938_v1 = vadd.f32 %v1934_v2, %v1811_v41  ;;  %v2426_v41 = vld [vmem:[%s3426_s11 + $0xb8] sm:$0xff] }
 0xfeb   : > { %2158 = vmatpush.msrb.mxu1 %v2426_v41 }
 0xfec   : > { %v1940_v42 = vadd.f32 %v1938_v1, %v3132_v17 }
 0xfee   : > { %v3267_v43 = vadd.f32 %v2545_v36, %v1940_v42  ;;  %v2425_v42 = vld [vmem:[%s3426_s11 + $0xb0] sm:$0xff] }
 0xfef   : > { %2159 = vmatpush.msrb.mxu1 %v2425_v42 }
 0xff0   : > { %v1955_v10 = vsel %vm501_vm0, %v3267_v43, 0.0 }
 0xff1   : > { %1956 = vadd.xlane.f32.xlu0 %v1955_v10 }
0x1039   : > { %v1954_v39 = vpop.xlane.xlu2 %1953 }
0x103a   : > { %v1958_v44 = vmul.f32 %v1954_v39, %v2871_v14 }
0x103c   : > { %v1960_v45 = vsub.f32 %v3261_v37, %v1958_v44  ;;  %v2424_v44 = vld [vmem:[%s3426_s11 + $0xa8] sm:$0xff] }
0x103d   : > { %2160 = vmatpush.msrb.mxu1 %v2424_v44 }
0x103e   : > { %v1962_v46 = vmul.f32 %v1960_v45, %v1960_v45 }
0x1040   : > { %v1964_v19 = vsel %vm501_vm0, %v1962_v46, 0.0 }
0x1041   : > { %1965 = vadd.xlane.f32.xlu0 %v1964_v19  ;;  %v2423_v19 = vld [vmem:[%s3426_s11 + $0xa0] sm:$0xff] }
0x1042   : > { %2161 = vmatpush.msrb.mxu1 %v2423_v19 }
0x1064   : > { %v1957_v49 = vpop.xlane.xlu0 %1956 }
0x1065   : > { %v1959_v16 = vmul.f32 %v1957_v49, %v2871_v14 }
0x1067   : > { %v1961_v17 = vsub.f32 %v3267_v43, %v1959_v16 }
0x1069   : > { %v1963_v50 = vmul.f32 %v1961_v17, %v1961_v17 }
0x106b   : > { %v1967_v51 = vsel %vm501_vm0, %v1963_v50, 0.0 }
0x106c   : > { %1968 = vadd.xlane.f32.xlu0 %v1967_v51  ;;  %v2421_v51 = vld [vmem:[%s3426_s11 + $0x90] sm:$0xff] }
0x10b4   : > { %v1966_v56 = vpop.xlane.xlu0 %1965 }
0x10b5   : > { %v1970_v57 = vmul.f32 %v1966_v56, %v2871_v14  ;;  %v2419_v56 = vld [vmem:[%s3426_s11 + $0x80] sm:$0xff] }
0x10b7   : > { %v1972_v58 = vadd.f32 1e-05, %v1970_v57 }
0x10b9   : > { %2634 = vrsqrt.f32 %v1972_v58  ;;  %vm1980_vm9 = vweird.f32 %v1972_v58 }
0x10bf   : > { %v2635_v59 = vpop.eup %2634 }
0x10c0   : > { %v1975_v60 = vmul.f32 %v2635_v59, %v1972_v58  ;;  %vm1981_vm8 = vweird.f32 %v2635_v59 }
0x10c1   : > { %vm1982_vm2 = vmor %vm1980_vm9, %vm1981_vm8 }
0x10c2   : > { %v1976_v61 = vmul.f32 %v2635_v59, %v1975_v60 }
0x10c4   : > { %v1977_v62 = vmul.f32 0.5, %v1976_v61 }
0x10c6   : > { %v1978_v63 = vsub.f32 1.5, %v1977_v62 }
0x10c8   : > { %v1979_v0 = vmul.f32 %v2635_v59, %v1978_v63 }
0x10ca   : > { %v1983_v7 = vsel %vm1982_vm2, %v2635_v59, %v1979_v0 }
0x10cb   : > { %v1994_v33 = vmul.f32 %v1983_v7, %v1960_v45 }
0x10cd   : > { %v1999_v9 = vmul.f32 %v2546_v4, %v1994_v33 }
0x10cf   : > { %v2004_v12 = vadd.f32 %v2547_v8, %v1999_v9 }
0x10d1   : > { %2415 = vmatmul.msk.f32.vlgmr.msrb.gmra.mxu0 %vm501_vm0, %v2004_v12 }
0x10df   : > { %v1969_v47 = vpop.xlane.xlu0 %1968 }
0x10e0   : > { %v1971_v13 = vmul.f32 %v1969_v47, %v2871_v14 }
0x10e2   : > { %v1973_v15 = vadd.f32 1e-05, %v1971_v13 }
0x10e4   : > { %2636 = vrsqrt.f32 %v1973_v15  ;;  %vm1990_vm4 = vweird.f32 %v1973_v15 }
0x10ea   : > { %v2637_v11 = vpop.eup %2636 }
0x10eb   : > { %v1985_v48 = vmul.f32 %v2637_v11, %v1973_v15  ;;  %vm1991_vm3 = vweird.f32 %v2637_v11 }
0x10ec   : > { %vm1992_vm5 = vmor %vm1990_vm4, %vm1991_vm3 }
0x10ed   : > { %v1986_v18 = vmul.f32 %v2637_v11, %v1985_v48 }
0x10ef   : > { %v1987_v21 = vmul.f32 0.5, %v1986_v18 }
0x10f1   : > { %v1988_v22 = vsub.f32 1.5, %v1987_v21 }
0x10f3   : > { %v1989_v6 = vmul.f32 %v2637_v11, %v1988_v22 }
0x10f5   : > { %v1993_v23 = vsel %vm1992_vm5, %v2637_v11, %v1989_v6 }
0x10f6   : > { %v1995_v24 = vmul.f32 %v1993_v23, %v1961_v17  ;;  %v2422_v17 = vld [vmem:[%s3426_s11 + $0x98] sm:$0xff] }
0x10f7   : > { %2162 = vmatpush.msrb.mxu1 %v2422_v17 }
0x10f8   : > { %v2000_v25 = vmul.f32 %v2546_v4, %v1995_v24 }
0x10f9   : > { %2163 = vmatpush.msrb.mxu1 %v2421_v51 }
0x10fa   : > { %v2005_v26 = vadd.f32 %v2547_v8, %v2000_v25 }
0x10fb   : > { %2164 = vmatpush.msrb.mxu1 %v2420_v54 }
0x10fc   : > { %2416 = vmatmul.msk.f32.gmra.mxu0 %vm501_vm0, %v2005_v26 }
0x10fd   : > { %2165 = vmatpush.msrb.mxu1 %v2419_v56 }
0x114e   : > { %v2039_v31 = vpop.f32.mrf.mxu0 }
0x114f   : > { %v3320_v34 = vadd.f32 %v3311_v30, %v2039_v31 }
0x1151   : > { %v2047_v36 = vmul.f32 0.70710677, %v3320_v34  ;;  %v2045_v25 = vmul.f32 0.5, %v3320_v34 }
0x1153   : > { %v2049_v38 = vmul.f32 %v2047_v36, %v2047_v36 }
0x1155   : > { %v2050_v40 = vmin.f32 %v2049_v38, 16.0 }
0x1157   : > { %v2051_v2 = vmul.f32 2.1237322e-06, %v2050_v40  ;;  %v2062_v1 = vmul.f32 3.8918573e-05, %v2050_v40 }
0x1159   : > { %v2052_v10 = vadd.f32 0.00028619796, %v2051_v2  ;;  %v2063_v39 = vadd.f32 0.001143296, %v2062_v1 }
0x115b   : > { %v2053_v45 = vmul.f32 %v2052_v10, %v2050_v40  ;;  %v2064_v46 = vmul.f32 %v2063_v39, %v2050_v40 }
0x115d   : > { %v2065_v49 = vadd.f32 0.014752088, %v2064_v46  ;;  %v2054_v16 = vadd.f32 0.0036580483, %v2053_v45 }
0x115f   : > { %v2066_v50 = vmul.f32 %v2065_v49, %v2050_v40  ;;  %v2055_v53 = vmul.f32 %v2054_v16, %v2050_v40 }
0x1161   : > { %v2067_v52 = vadd.f32 0.112945676, %v2066_v50  ;;  %v2056_v58 = vadd.f32 0.05243302, %v2055_v53 }
0x1163   : > { %v2068_v55 = vmul.f32 %v2067_v52, %v2050_v40  ;;  %v2057_v61 = vmul.f32 %v2056_v58, %v2050_v40 }
0x1165   : > { %v2069_v57 = vadd.f32 0.4994258, %v2068_v55  ;;  %v2058_v62 = vadd.f32 0.18741608, %v2057_v61  ;;  %v2549_v61 = vld [vmem:[%s3427_s12 + $0x1] ss:$0 sm:$0xff] }
0x1167   : > { %v2070_v59 = vmul.f32 %v2069_v57, %v2050_v40  ;;  %v2059_v0 = vmul.f32 %v2058_v62, %v2050_v40 }
0x1169   : > { %v2071_v60 = vadd.f32 1.0, %v2070_v59  ;;  %v2060_v8 = vadd.f32 1.1283791, %v2059_v0 }
0x116b   : > { %2638 = vrcp.f32 %v2071_v60  ;;  %v2083_v33 = vand.u32 2147483648, %v2071_v60  ;;  %v2081_v12 = vand.u32 2147483647, %v2071_v60  ;;  %vm2077_vm7 = vweird.f32 %v2071_v60 }
0x116c   : > { %v2061_v11 = vmul.f32 %v2060_v8, %v2047_v36 }
0x116d   : > { %v2084_v13 = vor.u32 1.1754944e-38, %v2083_v33  ;;  %vm2082_vm11 = vcmp.eq.f32.partialorder %v2081_v12, 8.507059e+37 }
0x1171   : > { %v2639_v63 = vpop.eup %2638 }
0x1172   : > { %v2073_v4 = vmul.f32 %v2639_v63, %v2071_v60  ;;  %vm2078_vm6 = vweird.f32 %v2639_v63 }
0x1173   : > { %vm2079_vm10 = vmor %vm2077_vm7, %vm2078_vm6 }
0x1174   : > { %v2074_v7 = vsub.f32 1.0, %v2073_v4 }
0x1176   : > { %v2075_v9 = vmul.f32 %v2639_v63, %v2074_v7 }
0x1178   : > { %v2076_v47 = vadd.f32 %v2639_v63, %v2075_v9 }
0x1179   : > { %v2042_v15 = vpop.f32.mrf.mxu0 }
0x117a   : > { %v2080_v48 = vsel %vm2079_vm10, %v2639_v63, %v2076_v47  ;;  %v2043_v18 = vadd.f32 %v3311_v30, %v2042_v15 }
0x117b   : > { %v2085_v21 = vsel %vm2082_vm11, %v2084_v13, %v2080_v48 }
0x117c   : > { %v2086_v22 = vmul.f32 %v2085_v21, %v2061_v11  ;;  %v2048_v6 = vmul.f32 0.70710677, %v2043_v18  ;;  %v2046_v58 = vmul.f32 0.5, %v2043_v18 }
0x117e   : > { %v2417_v23 = vclamps-f32 %v2086_v22, 1.0  ;;  %v2089_v24 = vmul.f32 %v2048_v6, %v2048_v6 }
0x1180   : > { %v2129_v26 = vadd.f32 1.0, %v2417_v23  ;;  %v2090_v28 = vmin.f32 %v2089_v24, 16.0 }
0x1182   : > { %v2131_v29 = vmul.f32 %v2129_v26, %v2045_v25  ;;  %v2091_v5 = vmul.f32 2.1237322e-06, %v2090_v28  ;;  %v2102_v27 = vmul.f32 3.8918573e-05, %v2090_v28 }
0x1184   : > { %v2092_v31 = vadd.f32 0.00028619796, %v2091_v5  ;;  %2166 = vmatmul.f32.vlgmr.msrb.gmra.mxu1 %v2131_v29  ;;  %v2103_v32 = vadd.f32 0.001143296, %v2102_v27  ;;  %v2550_v27 = vld [vmem:[%s3428_s13] ss:$0 sm:$0xff] }
0x1186   : > { %v2093_v35 = vmul.f32 %v2092_v31, %v2090_v28  ;;  %v2104_v36 = vmul.f32 %v2103_v32, %v2090_v28  ;;  %v2551_v32 = vld [vmem:[%s3429_s14] ss:$0 sm:$0xff] }
0x1188   : > { %v2105_v3 = vadd.f32 0.014752088, %v2104_v36  ;;  %v2094_v38 = vadd.f32 0.0036580483, %v2093_v35 }
0x118a   : > { %v2106_v30 = vmul.f32 %v2105_v3, %v2090_v28  ;;  %v2095_v40 = vmul.f32 %v2094_v38, %v2090_v28 }
0x118c   : > { %v2107_v20 = vadd.f32 0.112945676, %v2106_v30  ;;  %v2096_v1 = vadd.f32 0.05243302, %v2095_v40 }
0x118e   : > { %v2108_v41 = vmul.f32 %v2107_v20, %v2090_v28  ;;  %v2097_v10 = vmul.f32 %v2096_v1, %v2090_v28 }
0x1190   : > { %v2109_v2 = vadd.f32 0.4994258, %v2108_v41  ;;  %v2098_v39 = vadd.f32 0.18741608, %v2097_v10 }
0x1192   : > { %v2110_v42 = vmul.f32 %v2109_v2, %v2090_v28  ;;  %v2099_v45 = vmul.f32 %v2098_v39, %v2090_v28 }
0x1194   : > { %v2111_v34 = vadd.f32 1.0, %v2110_v42  ;;  %v2100_v16 = vadd.f32 1.1283791, %v2099_v45 }
0x1196   : > { %2640 = vrcp.f32 %v2111_v34  ;;  %v2123_v49 = vand.u32 2147483648, %v2111_v34  ;;  %v2121_v50 = vand.u32 2147483647, %v2111_v34  ;;  %vm2117_vm13 = vweird.f32 %v2111_v34 }
0x1197   : > { %v2101_v53 = vmul.f32 %v2100_v16, %v2048_v6 }
0x1198   : > { %v2124_v52 = vor.u32 1.1754944e-38, %v2123_v49  ;;  %vm2122_vm15 = vcmp.eq.f32.partialorder %v2121_v50, 8.507059e+37 }
0x119c   : > { %v2641_v44 = vpop.eup %2640 }
0x119d   : > { %v2113_v46 = vmul.f32 %v2641_v44, %v2111_v34  ;;  %vm2118_vm12 = vweird.f32 %v2641_v44 }
0x119e   : > { %vm2119_vm14 = vmor %vm2117_vm13, %vm2118_vm12 }
0x119f   : > { %v2114_v19 = vsub.f32 1.0, %v2113_v46 }
0x11a1   : > { %v2115_v17 = vmul.f32 %v2641_v44, %v2114_v19 }
0x11a3   : > { %v2116_v51 = vadd.f32 %v2641_v44, %v2115_v17 }
0x11a5   : > { %v2120_v54 = vsel %vm2119_vm14, %v2641_v44, %v2116_v51 }
0x11a6   : > { %v2125_v55 = vsel %vm2122_vm15, %v2124_v52, %v2120_v54 }
0x11a7   : > { %v2126_v56 = vmul.f32 %v2125_v55, %v2101_v53 }
0x11a9   : > { %v2418_v57 = vclamps-f32 %v2126_v56, 1.0 }
0x11ab   : > { %v2130_v59 = vadd.f32 1.0, %v2418_v57 }
0x11ad   : > { %v2132_v60 = vmul.f32 %v2130_v59, %v2046_v58 }
0x11af   : > { %2169 = vmatmul.f32.gmra.mxu1 %v2132_v60 }
0x1201   : > { %v2167_v62 = vpop.f32.mrf.mxu1 }
0x1202   : > { %v2173_v63 = vadd.f32 %v2167_v62, %v3261_v37 }
0x1204   : > { %v2180_v0 = vadd.f32 %v2549_v61, %v2173_v63 }
0x1206   : > { %v2184_v4 = vsel %vm501_vm0, %v2180_v0, 0.0 }
0x1207   : > { %2185 = vadd.xlane.f32.xlu1 %v2184_v4 }
0x122c   : > { %v2170_v7 = vpop.f32.mrf.mxu1 }
0x122d   : > { %v2174_v33 = vadd.f32 %v2170_v7, %v3267_v43 }
0x122f   : > { %v2181_v8 = vadd.f32 %v2549_v61, %v2174_v33 }
0x1231   : > { %v2187_v9 = vsel %vm501_vm0, %v2181_v8, 0.0 }
0x1232   : > { %2188 = vadd.xlane.f32.xlu0 %v2187_v9 }
0x127a   : > { %v2186_v12 = vpop.xlane.xlu1 %2185 }
0x127b   : > { %v2190_v47 = vmul.f32 %v2186_v12, %v2871_v14 }
0x127d   : > { %v2192_v13 = vsub.f32 %v2180_v0, %v2190_v47 }
0x127f   : > { %v2194_v15 = vmul.f32 %v2192_v13, %v2192_v13 }
0x1281   : > { %v2196_v11 = vsel %vm501_vm0, %v2194_v15, 0.0 }
0x1282   : > { %2197 = vadd.xlane.f32.xlu2 %v2196_v11 }
0x12a5   : > { %v2189_v37 = vpop.xlane.xlu0 %2188 }
0x12a6   : > { %v2191_v48 = vmul.f32 %v2189_v37, %v2871_v14 }
0x12a8   : > { %v2193_v18 = vsub.f32 %v2181_v8, %v2191_v48 }
0x12aa   : > { %v2195_v21 = vmul.f32 %v2193_v18, %v2193_v18 }
0x12ac   : > { %v2199_v43 = vsel %vm501_vm0, %v2195_v21, 0.0 }
0x12ad   : > { %2200 = vadd.xlane.f32.xlu1 %v2199_v43 }
0x12f5   : > { %v2198_v22 = vpop.xlane.xlu2 %2197 }
0x12f6   : > { %v2202_v6 = vmul.f32 %v2198_v22, %v2871_v14 }
0x12f8   : > { %v2204_v23 = vadd.f32 1e-05, %v2202_v6 }
0x12fa   : > { %2642 = vrsqrt.f32 %v2204_v23  ;;  %vm2212_vm8 = vweird.f32 %v2204_v23 }
0x1300   : > { %v2643_v24 = vpop.eup %2642 }
0x1301   : > { %v2207_v25 = vmul.f32 %v2643_v24, %v2204_v23  ;;  %vm2213_vm1 = vweird.f32 %v2643_v24 }
0x1302   : > { %vm2214_vm9 = vmor %vm2212_vm8, %vm2213_vm1 }
0x1303   : > { %v2208_v26 = vmul.f32 %v2643_v24, %v2207_v25 }
0x1305   : > { %v2209_v28 = vmul.f32 0.5, %v2208_v26 }
0x1307   : > { %v2210_v29 = vsub.f32 1.5, %v2209_v28 }
0x1309   : > { %v2211_v5 = vmul.f32 %v2643_v24, %v2210_v29 }
0x130b   : > { %v2215_v31 = vsel %vm2214_vm9, %v2643_v24, %v2211_v5 }
0x130c   : > { %v2226_v35 = vmul.f32 %v2215_v31, %v2192_v13 }
0x130e   : > { %v2231_v36 = vmul.f32 %v2550_v27, %v2226_v35 }
0x1310   : > { %v2236_v3 = vadd.f32 %v2551_v32, %v2231_v36 }
0x1312   : > { %2238 = vst.msk [vmem:[%s487_s25] sm:$0xff] %vm501_vm0, %v2236_v3 }
0x1320   : > { %v2201_v38 = vpop.xlane.xlu1 %2200 }
0x1321   : > { %v2203_v30 = vmul.f32 %v2201_v38, %v2871_v14 }
0x1323   : > { %v2205_v20 = vadd.f32 1e-05, %v2203_v30 }
0x1325   : > { %2644 = vrsqrt.f32 %v2205_v20  ;;  %vm2222_vm3 = vweird.f32 %v2205_v20 }
0x132b   : > { %v2645_v40 = vpop.eup %2644 }
0x132c   : > { %v2217_v41 = vmul.f32 %v2645_v40, %v2205_v20  ;;  %vm2223_vm2 = vweird.f32 %v2645_v40 }
0x132d   : > { %vm2224_vm4 = vmor %vm2222_vm3, %vm2223_vm2 }
0x132e   : > { %v2218_v2 = vmul.f32 %v2645_v40, %v2217_v41 }
0x1330   : > { %v2219_v1 = vmul.f32 0.5, %v2218_v2 }
0x1332   : > { %v2220_v42 = vsub.f32 1.5, %v2219_v1 }
0x1334   : > { %v2221_v34 = vmul.f32 %v2645_v40, %v2220_v42 }
0x1336   : > { %v2225_v10 = vsel %vm2224_vm4, %v2645_v40, %v2221_v34 }
0x1337   : > { %v2227_v14 = vmul.f32 %v2225_v10, %v2193_v18 }
0x1339   : > { %v2232_v39 = vmul.f32 %v2550_v27, %v2227_v14 }
0x133b   : > { %v2237_v44 = vadd.f32 %v2551_v32, %v2232_v39 }
0x133d   : > { %2239 = vst.msk [vmem:[%s487_s25 + $0x8] sm:$0xff] %vm501_vm0, %v2237_v44 }
0x133e   : > { %2673 = shalt.err (!%p2670_p3)
}
0x133f   : > { %s2722_s17 = smov 128   ;;  %s2723_s25 = smov 8  }
0x1340   : > { %2443 = dma.vmem_to_hbm [thread:$0]  (%p2842_p5), %s2254_s27, 256, %s2256_s20, %s2241_s22, %s2722_s17, %s2722_s17, %s2723_s25  }
0x1341 PF: > { %p2449_p4 = scmp.ge.s32.totalorder %s2708_s21, 2  ;;  %s2270_s16 = sand.u32 1, %s2696_s18  }
0x1342   : > { %s2271_s1 = scalar_lea.sflag [#allocation3], %s2270_s16 }
0x1343   : > { %p2446_p7 = pnand %p2449_p4, %p2846_p6 }
0x1345   : > { %p2447_p8 = pneg %p2446_p7 }
0x1347   : > { %2691 = dma.done.wait (%p2447_p8), %s2271_s1, 256  }
0x1348   : > { %2693 = vsyncadd (%p2447_p8), %s2271_s1, 4294967040  ;;  %s3472_s21 = sld [smem:[#allocation6_spill]]  ;;  %s3475_s18 = smov %s2700_s19 }
0x1349   : > { %s3473_s24 = sld [smem:[#allocation5_spill]] }
0x134a   : > { %s3474_s20 = sld [smem:[#allocation7_spill]] }
0x134e   : > { %p25_p9 = scmp.ge.s32.totalorder %s3472_s21, 4  }
0x134f   : > { %s3476_s19 = smov %s3473_s24 }
0x1350   :  { %27 = sbr.rel (!%p25_p9) target bundleno = 6 (0x6), region = 126 }
0x1355   :  { %2277 = vsyncpa [#allocation3], 1 }
0x1356   :  { %2279 = vsyncpa [#allocation3 + $0x1], 1 }

</bundles_post_ra>
